<compile_context>
chip_gen: v7x
topology: tpu7x:2x2x1
jax: 0.10.0
libtpu: 0.0.40
codegen_flags: <defaults>
</compile_context>

<pallas_src>
import functools
import math

import jax
import jax.numpy as jnp
from jax.experimental import pallas as pl
from jax.experimental.pallas import tpu as pltpu


def _round_up(x, m):
    return (x + m - 1) // m * m


def _titans_kernel(seq_len, tile, scale, needs_mask,
                   xq_ref, xkv_ref,
                   w1_ref, b1_ref, w2_ref, b2_ref,
                   wq_ref, wk_ref, wv_ref, wo_ref,
                   o_ref,
                   q_sc, m_sc, l_sc, acc_sc):
    """One (batch, q-tile, kv-tile) grid step with online softmax."""
    ki = pl.program_id(2)
    nkv = pl.num_programs(2)
    f32 = jnp.float32
    bf16 = jnp.bfloat16

    # ---- init accumulators + Q projection: once per (batch, q-tile) ----
    @pl.when(ki == 0)
    def _():
        m_sc[...] = jnp.full_like(m_sc, -1e30)
        l_sc[...] = jnp.zeros_like(l_sc)
        acc_sc[...] = jnp.zeros_like(acc_sc)
        q_sc[...] = jnp.dot(xq_ref[...].astype(bf16),
                            wq_ref[...].astype(bf16),
                            preferred_element_type=f32)

    # ---- LongTermMemory MLP on this kv tile (never resident for all S) ----
    # NOTE: memory is recomputed per q-tile; a two-pass design could cache it,
    # but this keeps live intermediates at O(T*H) and the MXU as the binding unit.
    xkv = xkv_ref[...].astype(bf16)
    h = jnp.dot(xkv, w1_ref[...].astype(bf16),
                preferred_element_type=f32) + b1_ref[...]
    h = jnp.maximum(h, 0.0)
    mem = jnp.dot(h.astype(bf16), w2_ref[...].astype(bf16),
                  preferred_element_type=f32) + b2_ref[...]
    mem_b = mem.astype(bf16)
    k = jnp.dot(mem_b, wk_ref[...].astype(bf16), preferred_element_type=f32)
    v = jnp.dot(mem_b, wv_ref[...].astype(bf16), preferred_element_type=f32)

    # ---- scores: contract the H dims directly (no explicit k.T) ----
    s = jax.lax.dot_general(q_sc[...].astype(bf16), k.astype(bf16),
                            dimension_numbers=(((1,), (1,)), ((), ())),
                            preferred_element_type=f32) * scale

    if needs_mask:
        kv_idx = ki * tile + jax.lax.broadcasted_iota(jnp.int32, s.shape, 1)
        s = jnp.where(kv_idx < seq_len, s, -1e30)

    # ---- online softmax update (f32 on the VPU/EUP) ----
    m_prev = m_sc[...]
    m_new = jnp.maximum(m_prev, jnp.max(s, axis=-1, keepdims=True))
    alpha = jnp.exp(m_prev - m_new)
    p = jnp.exp(s - m_new)
    l_sc[...] = alpha * l_sc[...] + jnp.sum(p, axis=-1, keepdims=True)
    acc_sc[...] = alpha * acc_sc[...] + jnp.dot(p.astype(bf16),
                                                v.astype(bf16),
                                                preferred_element_type=f32)
    m_sc[...] = m_new

    # ---- epilogue fused into the last kv step: normalize + output proj ----
    @pl.when(ki == nkv - 1)
    def _():
        a = acc_sc[...] * pl.reciprocal(l_sc[...], approx=True)
        out = jnp.dot(a.astype(bf16), wo_ref[...].astype(bf16),
                      preferred_element_type=f32)
        o_ref[...] = out.astype(o_ref.dtype)


def titans_forward(x, params, *, seq_tile=128):
    """x: (B, S, D) float32.  params: dict of weight arrays.

    Pads D/H to multiples of 128 (lane-dense) and S to a multiple of the
    sequence tile; padding is sliced off before returning.
    Use seq_tile=256 on v6e/v7x to fill the larger MXU.
    """
    B, S, D = x.shape
    H = params["w1"].shape[1]

    Dp = _round_up(D, 128)
    Hp = _round_up(H, 128)
    T = min(seq_tile, _round_up(S, 8))
    S_pad = _round_up(S, T)
    needs_mask = (S_pad != S)

    # zero-pad activations / weights to lane-dense shapes
    xp = jnp.zeros((B, S_pad, Dp), x.dtype).at[:, :S, :D].set(x)

    def pad2(a, r, c):
        return jnp.zeros((r, c), a.dtype).at[:a.shape[0], :a.shape[1]].set(a)

    w1 = pad2(params["w1"], Dp, Hp); b1 = pad2(params["b1"], 1, Hp)
    w2 = pad2(params["w2"], Hp, Dp); b2 = pad2(params["b2"], 1, Dp)
    wq = pad2(params["wq"], Dp, Hp); wk = pad2(params["wk"], Dp, Hp)
    wv = pad2(params["wv"], Dp, Hp); wo = pad2(params["wo"], Hp, Dp)

    nq = S_pad // T
    nkv = S_pad // T
    scale = 1.0 / math.sqrt(H)   # scale uses the *unpadded* hidden size

    def wspec(shape):
        # full-array weight block, constant index -> DMA'd once, not re-streamed
        # (index is unchanged across the whole grid).
        return pl.BlockSpec(shape, lambda b, qi, ki: (0,) * len(shape))

    grid_spec = pltpu.PrefetchScalarGridSpec(
        num_scalar_prefetch=0,
        grid=(B, nq, nkv),                                   # kv (reduction) last
        in_specs=[
            pl.BlockSpec((None, T, Dp), lambda b, qi, ki: (b, qi, 0)),  # x (q rows)
            pl.BlockSpec((None, T, Dp), lambda b, qi, ki: (b, ki, 0)),  # x (kv rows)
            wspec((Dp, Hp)),   # w1
            wspec((1, Hp)),    # b1
            wspec((Hp, Dp)),   # w2
            wspec((1, Dp)),    # b2
            wspec((Dp, Hp)),   # wq
            wspec((Dp, Hp)),   # wk
            wspec((Dp, Hp)),   # wv
            wspec((Hp, Dp)),   # wo
        ],
        out_specs=pl.BlockSpec((None, T, Dp), lambda b, qi, ki: (b, qi, 0)),
        scratch_shapes=[
            pltpu.VMEM((T, Hp), jnp.float32),   # q tile
            pltpu.VMEM((T, 1), jnp.float32),    # m (running max)
            pltpu.VMEM((T, 1), jnp.float32),    # l (running denom)
            pltpu.VMEM((T, Hp), jnp.float32),   # acc (unnormalized output)
        ],
    )

    flops = int(B * nq * nkv * (8 * T * Dp * Hp + 4 * T * T * Hp)
                + B * nq * 4 * T * Dp * Hp)
    transcendentals = int(B * nq * nkv * T * T)
    bytes_accessed = int(4 * (3 * B * S_pad * Dp + 6 * Dp * Hp + Hp + Dp))

    kernel = functools.partial(_titans_kernel, S, T, scale, needs_mask)

    out = pl.pallas_call(
        kernel,
        out_shape=jax.ShapeDtypeStruct((B, S_pad, Dp), x.dtype),
        grid_spec=grid_spec,
        compiler_params=pltpu.CompilerParams(
            dimension_semantics=("parallel", "parallel", "arbitrary"),
            vmem_limit_bytes=32 * 1024 * 1024,
        ),
        cost_estimate=pl.CostEstimate(
            flops=flops,
            transcendentals=transcendentals,
            bytes_accessed=bytes_accessed,
        ),
    )(xp, xp, w1, b1, w2, b2, wq, wk, wv, wo)

    return out[:, :S, :D]


def init_params(key, input_size, hidden_size):
    ks = jax.random.split(key, 8)
    sd_in = 1.0 / math.sqrt(input_size)
    sd_h = 1.0 / math.sqrt(hidden_size)
    return {
        "w1": jax.random.normal(ks[0], (input_size, hidden_size), jnp.float32) * sd_in,
        "b1": jnp.zeros((1, hidden_size), jnp.float32),
        "w2": jax.random.normal(ks[1], (hidden_size, input_size), jnp.float32) * sd_h,
        "b2": jnp.zeros((1, input_size), jnp.float32),
        "wq": jax.random.normal(ks[2], (input_size, hidden_size), jnp.float32) * sd_in,
        "wk": jax.random.normal(ks[3], (input_size, hidden_size), jnp.float32) * sd_in,
        "wv": jax.random.normal(ks[4], (input_size, hidden_size), jnp.float32) * sd_in,
        "wo": jax.random.normal(ks[5], (hidden_size, input_size), jnp.float32) * sd_h,
    }


def reference_forward(x, p):
    """Plain-JAX f32 reference for correctness checking."""
    h = jnp.maximum(x @ p["w1"] + p["b1"], 0.0)
    mem = h @ p["w2"] + p["b2"]
    q, k, v = x @ p["wq"], mem @ p["wk"], mem @ p["wv"]
    s = jnp.einsum("bqh,bkh->bqk", q, k) / math.sqrt(q.shape[-1])
    a = jax.nn.softmax(s, axis=-1)
    return jnp.einsum("bqk,bkh->bqh", a, v) @ p["wo"]


if __name__ == "__main__":
    key = jax.random.PRNGKey(0)
    kx, kp = jax.random.split(key)

    B, S = 2, 256                 # small, but exercises 2 q-tiles x 2 kv-tiles
    input_size, hidden_size = 16, 32

    x = jax.random.normal(kx, (B, S, input_size), jnp.float32)
    params = init_params(kp, input_size, hidden_size)

    out = jax.block_until_ready(titans_forward(x, params))

    ref = reference_forward(x, params)
    assert out.shape == (B, S, input_size)
    # bf16 MXU operands with f32 accumulation -> compare loosely vs f32 reference
    assert jnp.allclose(out, ref, atol=5e-2, rtol=5e-2), "mismatch vs reference"

    print("KERNEL_OK")
</pallas_src>

<mosaic_0001>
module attributes {stable_mosaic.version = 11 : i64} {
  func.func @_titans_kernel(%arg0: i32, %arg1: i32, %arg2: i32, %arg3: memref<1x128x128xf32, #tpu.memory_space<vmem>>, %arg4: memref<1x128x128xf32, #tpu.memory_space<vmem>>, %arg5: memref<128x128xf32, #tpu.memory_space<vmem>>, %arg6: memref<1x128xf32, #tpu.memory_space<vmem>>, %arg7: memref<128x128xf32, #tpu.memory_space<vmem>>, %arg8: memref<1x128xf32, #tpu.memory_space<vmem>>, %arg9: memref<128x128xf32, #tpu.memory_space<vmem>>, %arg10: memref<128x128xf32, #tpu.memory_space<vmem>>, %arg11: memref<128x128xf32, #tpu.memory_space<vmem>>, %arg12: memref<128x128xf32, #tpu.memory_space<vmem>>, %arg13: memref<1x128x128xf32, #tpu.memory_space<vmem>>, %arg14: memref<128x128xf32, #tpu.memory_space<vmem>>, %arg15: memref<128x1xf32, #tpu.memory_space<vmem>>, %arg16: memref<128x1xf32, #tpu.memory_space<vmem>>, %arg17: memref<128x128xf32, #tpu.memory_space<vmem>>) attributes {dimension_semantics = [#tpu.dimension_semantics<parallel>, #tpu.dimension_semantics<parallel>, #tpu.dimension_semantics<arbitrary>], iteration_bounds = array<i64: 2, 2, 2>, scalar_prefetch = 0 : i64, scratch_operands = 4 : i64, tpu.core_type = #tpu.core_type<tc>, window_params = [{transform_indices = @transform_0, window_bounds = array<i64: 1, 128, 128>}, {transform_indices = @transform_1, window_bounds = array<i64: 1, 128, 128>}, {pipeline_mode = #tpu.pipeline_mode<synchronous>, transform_indices = @transform_2, window_bounds = array<i64: 128, 128>}, {pipeline_mode = #tpu.pipeline_mode<synchronous>, transform_indices = @transform_3, window_bounds = array<i64: 1, 128>}, {pipeline_mode = #tpu.pipeline_mode<synchronous>, transform_indices = @transform_4, window_bounds = array<i64: 128, 128>}, {pipeline_mode = #tpu.pipeline_mode<synchronous>, transform_indices = @transform_5, window_bounds = array<i64: 1, 128>}, {pipeline_mode = #tpu.pipeline_mode<synchronous>, transform_indices = @transform_6, window_bounds = array<i64: 128, 128>}, {pipeline_mode = #tpu.pipeline_mode<synchronous>, transform_indices = @transform_7, window_bounds = array<i64: 128, 128>}, {pipeline_mode = #tpu.pipeline_mode<synchronous>, transform_indices = @transform_8, window_bounds = array<i64: 128, 128>}, {pipeline_mode = #tpu.pipeline_mode<synchronous>, transform_indices = @transform_9, window_bounds = array<i64: 128, 128>}, {transform_indices = @transform_10, window_bounds = array<i64: 1, 128, 128>}]} {
    %c0_i32 = arith.constant 0 : i32
    %0 = arith.cmpi eq, %arg2, %c0_i32 : i32
    %1 = arith.extui %0 : i1 to i32
    %c0_i32_0 = arith.constant 0 : i32
    %2 = arith.cmpi ne, %1, %c0_i32_0 : i32
    scf.if %2 {
      %cst_39 = arith.constant -1.000000e+30 : f32
      %61 = vector.broadcast %cst_39 : f32 to vector<128x1xf32>
      %c0_40 = arith.constant 0 : index
      %c0_41 = arith.constant 0 : index
      %62 = vector.load %arg15[%c0_40, %c0_41] : memref<128x1xf32, #tpu.memory_space<vmem>>, vector<128x1xf32>
      tpu.vector_store %arg15[%c0_40, %c0_41], %61 {strides = array<i32>} : memref<128x1xf32, #tpu.memory_space<vmem>>, vector<128x1xf32>,
      %cst_42 = arith.constant 0.000000e+00 : f32
      %63 = vector.broadcast %cst_42 : f32 to vector<128x1xf32>
      %c0_43 = arith.constant 0 : index
      %c0_44 = arith.constant 0 : index
      %64 = vector.load %arg16[%c0_43, %c0_44] : memref<128x1xf32, #tpu.memory_space<vmem>>, vector<128x1xf32>
      tpu.vector_store %arg16[%c0_43, %c0_44], %63 {strides = array<i32>} : memref<128x1xf32, #tpu.memory_space<vmem>>, vector<128x1xf32>,
      %cst_45 = arith.constant 0.000000e+00 : f32
      %65 = vector.broadcast %cst_45 : f32 to vector<128x128xf32>
      %c0_46 = arith.constant 0 : index
      %c0_47 = arith.constant 0 : index
      %66 = vector.load %arg17[%c0_46, %c0_47] : memref<128x128xf32, #tpu.memory_space<vmem>>, vector<128x128xf32>
      tpu.vector_store %arg17[%c0_46, %c0_47], %65 {strides = array<i32>} : memref<128x128xf32, #tpu.memory_space<vmem>>, vector<128x128xf32>,
      %c0_48 = arith.constant 0 : index
      %c0_49 = arith.constant 0 : index
      %c0_50 = arith.constant 0 : index
      %67 = vector.load %arg3[%c0_48, %c0_49, %c0_50] : memref<1x128x128xf32, #tpu.memory_space<vmem>>, vector<1x128x128xf32>
      %68 = vector.shape_cast %67 : vector<1x128x128xf32> to vector<128x128xf32>
      %69 = arith.truncf %68 : vector<128x128xf32> to vector<128x128xbf16>
      %c0_51 = arith.constant 0 : index
      %c0_52 = arith.constant 0 : index
      %70 = vector.load %arg9[%c0_51, %c0_52] : memref<128x128xf32, #tpu.memory_space<vmem>>, vector<128x128xf32>
      %71 = arith.truncf %70 : vector<128x128xf32> to vector<128x128xbf16>
      %cst_53 = arith.constant dense<0.000000e+00> : vector<128x128xf32>
      %72 = tpu.matmul %69, %71, %cst_53 {dimension_numbers = #tpu.dot_dimension_numbers<[1], [0], [0], [1], [0, 0, 1, 1], [], []>} : vector<128x128xbf16>, vector<128x128xbf16>, vector<128x128xf32> -> vector<128x128xf32>
      %c0_54 = arith.constant 0 : index
      %c0_55 = arith.constant 0 : index
      %73 = vector.load %arg14[%c0_54, %c0_55] : memref<128x128xf32, #tpu.memory_space<vmem>>, vector<128x128xf32>
      tpu.vector_store %arg14[%c0_54, %c0_55], %72 {strides = array<i32>} : memref<128x128xf32, #tpu.memory_space<vmem>>, vector<128x128xf32>,
    } else {
    }
    %c0 = arith.constant 0 : index
    %c0_1 = arith.constant 0 : index
    %c0_2 = arith.constant 0 : index
    %3 = vector.load %arg4[%c0, %c0_1, %c0_2] : memref<1x128x128xf32, #tpu.memory_space<vmem>>, vector<1x128x128xf32>
    %4 = vector.shape_cast %3 : vector<1x128x128xf32> to vector<128x128xf32>
    %5 = arith.truncf %4 : vector<128x128xf32> to vector<128x128xbf16>
    %c0_3 = arith.constant 0 : index
    %c0_4 = arith.constant 0 : index
    %6 = vector.load %arg5[%c0_3, %c0_4] : memref<128x128xf32, #tpu.memory_space<vmem>>, vector<128x128xf32>
    %7 = arith.truncf %6 : vector<128x128xf32> to vector<128x128xbf16>
    %cst = arith.constant dense<0.000000e+00> : vector<128x128xf32>
    %8 = tpu.matmul %5, %7, %cst {dimension_numbers = #tpu.dot_dimension_numbers<[1], [0], [0], [1], [0, 0, 1, 1], [], []>} : vector<128x128xbf16>, vector<128x128xbf16>, vector<128x128xf32> -> vector<128x128xf32>
    %c0_5 = arith.constant 0 : index
    %c0_6 = arith.constant 0 : index
    %9 = vector.load %arg6[%c0_5, %c0_6] : memref<1x128xf32, #tpu.memory_space<vmem>>, vector<1x128xf32>
    %10 = vector.broadcast %9 : vector<1x128xf32> to vector<128x128xf32>
    %11 = arith.addf %8, %10 : vector<128x128xf32>
    %cst_7 = arith.constant 0.000000e+00 : f32
    %12 = vector.broadcast %cst_7 : f32 to vector<128x128xf32>
    %13 = arith.maximumf %11, %12 : vector<128x128xf32>
    %14 = arith.truncf %13 : vector<128x128xf32> to vector<128x128xbf16>
    %c0_8 = arith.constant 0 : index
    %c0_9 = arith.constant 0 : index
    %15 = vector.load %arg7[%c0_8, %c0_9] : memref<128x128xf32, #tpu.memory_space<vmem>>, vector<128x128xf32>
    %16 = arith.truncf %15 : vector<128x128xf32> to vector<128x128xbf16>
    %cst_10 = arith.constant dense<0.000000e+00> : vector<128x128xf32>
    %17 = tpu.matmul %14, %16, %cst_10 {dimension_numbers = #tpu.dot_dimension_numbers<[1], [0], [0], [1], [0, 0, 1, 1], [], []>} : vector<128x128xbf16>, vector<128x128xbf16>, vector<128x128xf32> -> vector<128x128xf32>
    %c0_11 = arith.constant 0 : index
    %c0_12 = arith.constant 0 : index
    %18 = vector.load %arg8[%c0_11, %c0_12] : memref<1x128xf32, #tpu.memory_space<vmem>>, vector<1x128xf32>
    %19 = vector.broadcast %18 : vector<1x128xf32> to vector<128x128xf32>
    %20 = arith.addf %17, %19 : vector<128x128xf32>
    %21 = arith.truncf %20 : vector<128x128xf32> to vector<128x128xbf16>
    %c0_13 = arith.constant 0 : index
    %c0_14 = arith.constant 0 : index
    %22 = vector.load %arg10[%c0_13, %c0_14] : memref<128x128xf32, #tpu.memory_space<vmem>>, vector<128x128xf32>
    %23 = arith.truncf %22 : vector<128x128xf32> to vector<128x128xbf16>
    %cst_15 = arith.constant dense<0.000000e+00> : vector<128x128xf32>
    %24 = tpu.matmul %21, %23, %cst_15 {dimension_numbers = #tpu.dot_dimension_numbers<[1], [0], [0], [1], [0, 0, 1, 1], [], []>} : vector<128x128xbf16>, vector<128x128xbf16>, vector<128x128xf32> -> vector<128x128xf32>
    %c0_16 = arith.constant 0 : index
    %c0_17 = arith.constant 0 : index
    %25 = vector.load %arg11[%c0_16, %c0_17] : memref<128x128xf32, #tpu.memory_space<vmem>>, vector<128x128xf32>
    %26 = arith.truncf %25 : vector<128x128xf32> to vector<128x128xbf16>
    %cst_18 = arith.constant dense<0.000000e+00> : vector<128x128xf32>
    %27 = tpu.matmul %21, %26, %cst_18 {dimension_numbers = #tpu.dot_dimension_numbers<[1], [0], [0], [1], [0, 0, 1, 1], [], []>} : vector<128x128xbf16>, vector<128x128xbf16>, vector<128x128xf32> -> vector<128x128xf32>
    %c0_19 = arith.constant 0 : index
    %c0_20 = arith.constant 0 : index
    %28 = vector.load %arg14[%c0_19, %c0_20] : memref<128x128xf32, #tpu.memory_space<vmem>>, vector<128x128xf32>
    %29 = arith.truncf %28 : vector<128x128xf32> to vector<128x128xbf16>
    %30 = arith.truncf %24 : vector<128x128xf32> to vector<128x128xbf16>
    %cst_21 = arith.constant dense<0.000000e+00> : vector<128x128xf32>
    %31 = tpu.matmul %29, %30, %cst_21 {dimension_numbers = #tpu.dot_dimension_numbers<[1], [1], [0], [0], [0, 0, 1, 0], [], []>} : vector<128x128xbf16>, vector<128x128xbf16>, vector<128x128xf32> -> vector<128x128xf32>
    %cst_22 = arith.constant 0.176776692 : f32
    %32 = vector.broadcast %cst_22 : f32 to vector<128x128xf32>
    %33 = arith.mulf %31, %32 : vector<128x128xf32>
    %c0_23 = arith.constant 0 : index
    %c0_24 = arith.constant 0 : index
    %34 = vector.load %arg15[%c0_23, %c0_24] : memref<128x1xf32, #tpu.memory_space<vmem>>, vector<128x1xf32>
    %cst_25 = arith.constant dense<0xFF800000> : vector<128xf32>
    %35 = vector.multi_reduction <maximumf>, %33, %cst_25 [1] : vector<128x128xf32> to vector<128xf32>
    %36 = vector.shape_cast %35 : vector<128xf32> to vector<128x1xf32>
    %37 = arith.maximumf %34, %36 : vector<128x1xf32>
    %38 = arith.subf %34, %37 : vector<128x1xf32>
    %39 = math.exp %38 : vector<128x1xf32>
    %40 = vector.broadcast %37 : vector<128x1xf32> to vector<128x128xf32>
    %41 = arith.subf %33, %40 : vector<128x128xf32>
    %42 = math.exp %41 : vector<128x128xf32>
    %c0_26 = arith.constant 0 : index
    %c0_27 = arith.constant 0 : index
    %43 = vector.load %arg16[%c0_26, %c0_27] : memref<128x1xf32, #tpu.memory_space<vmem>>, vector<128x1xf32>
    %44 = arith.mulf %39, %43 : vector<128x1xf32>
    %cst_28 = arith.constant dense<0.000000e+00> : vector<128xf32>
    %45 = vector.multi_reduction <add>, %42, %cst_28 [1] : vector<128x128xf32> to vector<128xf32>
    %46 = vector.shape_cast %45 : vector<128xf32> to vector<128x1xf32>
    %47 = arith.addf %44, %46 : vector<128x1xf32>
    %c0_29 = arith.constant 0 : index
    %c0_30 = arith.constant 0 : index
    %48 = vector.load %arg16[%c0_29, %c0_30] : memref<128x1xf32, #tpu.memory_space<vmem>>, vector<128x1xf32>
    tpu.vector_store %arg16[%c0_29, %c0_30], %47 {strides = array<i32>} : memref<128x1xf32, #tpu.memory_space<vmem>>, vector<128x1xf32>,
    %c0_31 = arith.constant 0 : index
    %c0_32 = arith.constant 0 : index
    %49 = vector.load %arg17[%c0_31, %c0_32] : memref<128x128xf32, #tpu.memory_space<vmem>>, vector<128x128xf32>
    %50 = vector.broadcast %39 : vector<128x1xf32> to vector<128x128xf32>
    %51 = arith.mulf %50, %49 : vector<128x128xf32>
    %52 = arith.truncf %42 : vector<128x128xf32> to vector<128x128xbf16>
    %53 = arith.truncf %27 : vector<128x128xf32> to vector<128x128xbf16>
    %cst_33 = arith.constant dense<0.000000e+00> : vector<128x128xf32>
    %54 = tpu.matmul %52, %53, %cst_33 {dimension_numbers = #tpu.dot_dimension_numbers<[1], [0], [0], [1], [0, 0, 1, 1], [], []>} : vector<128x128xbf16>, vector<128x128xbf16>, vector<128x128xf32> -> vector<128x128xf32>
    %55 = arith.addf %51, %54 : vector<128x128xf32>
    %c0_34 = arith.constant 0 : index
    %c0_35 = arith.constant 0 : index
    %56 = vector.load %arg17[%c0_34, %c0_35] : memref<128x128xf32, #tpu.memory_space<vmem>>, vector<128x128xf32>
    tpu.vector_store %arg17[%c0_34, %c0_35], %55 {strides = array<i32>} : memref<128x128xf32, #tpu.memory_space<vmem>>, vector<128x128xf32>,
    %c0_36 = arith.constant 0 : index
    %c0_37 = arith.constant 0 : index
    %57 = vector.load %arg15[%c0_36, %c0_37] : memref<128x1xf32, #tpu.memory_space<vmem>>, vector<128x1xf32>
    tpu.vector_store %arg15[%c0_36, %c0_37], %37 {strides = array<i32>} : memref<128x1xf32, #tpu.memory_space<vmem>>, vector<128x1xf32>,
    %c1_i32 = arith.constant 1 : i32
    %58 = arith.cmpi eq, %arg2, %c1_i32 : i32
    %59 = arith.extui %58 : i1 to i32
    %c0_i32_38 = arith.constant 0 : i32
    %60 = arith.cmpi ne, %59, %c0_i32_38 : i32
    scf.if %60 {
      %c0_39 = arith.constant 0 : index
      %c0_40 = arith.constant 0 : index
      %61 = vector.load %arg17[%c0_39, %c0_40] : memref<128x128xf32, #tpu.memory_space<vmem>>, vector<128x128xf32>
      %c0_41 = arith.constant 0 : index
      %c0_42 = arith.constant 0 : index
      %62 = vector.load %arg16[%c0_41, %c0_42] : memref<128x1xf32, #tpu.memory_space<vmem>>, vector<128x1xf32>
      %63 = tpu.reciprocal %62 {approx = true} : vector<128x1xf32> -> vector<128x1xf32>
      %64 = vector.broadcast %63 : vector<128x1xf32> to vector<128x128xf32>
      %65 = arith.mulf %61, %64 : vector<128x128xf32>
      %66 = arith.truncf %65 : vector<128x128xf32> to vector<128x128xbf16>
      %c0_43 = arith.constant 0 : index
      %c0_44 = arith.constant 0 : index
      %67 = vector.load %arg12[%c0_43, %c0_44] : memref<128x128xf32, #tpu.memory_space<vmem>>, vector<128x128xf32>
      %68 = arith.truncf %67 : vector<128x128xf32> to vector<128x128xbf16>
      %cst_45 = arith.constant dense<0.000000e+00> : vector<128x128xf32>
      %69 = tpu.matmul %66, %68, %cst_45 {dimension_numbers = #tpu.dot_dimension_numbers<[1], [0], [0], [1], [0, 0, 1, 1], [], []>} : vector<128x128xbf16>, vector<128x128xbf16>, vector<128x128xf32> -> vector<128x128xf32>
      %c0_46 = arith.constant 0 : index
      %c0_47 = arith.constant 0 : index
      %c0_48 = arith.constant 0 : index
      %70 = vector.load %arg13[%c0_46, %c0_47, %c0_48] : memref<1x128x128xf32, #tpu.memory_space<vmem>>, vector<1x128x128xf32>
      %71 = vector.shape_cast %70 : vector<1x128x128xf32> to vector<128x128xf32>
      %72 = vector.shape_cast %69 : vector<128x128xf32> to vector<1x128x128xf32>
      tpu.vector_store %arg13[%c0_46, %c0_47, %c0_48], %72 {strides = array<i32>} : memref<1x128x128xf32, #tpu.memory_space<vmem>>, vector<1x128x128xf32>,
    } else {
    }
    return
  }
  func.func @transform_0(%arg0: i32, %arg1: i32, %arg2: i32) -> (i32, i32, i32) {
    %c0_i32 = arith.constant 0 : i32
    %c0_i32_0 = arith.constant 0 : i32
    return %arg0, %arg1, %c0_i32 : i32, i32, i32
  }
  func.func @transform_1(%arg0: i32, %arg1: i32, %arg2: i32) -> (i32, i32, i32) {
    %c0_i32 = arith.constant 0 : i32
    %c0_i32_0 = arith.constant 0 : i32
    return %arg0, %arg2, %c0_i32 : i32, i32, i32
  }
  func.func @transform_2(%arg0: i32, %arg1: i32, %arg2: i32) -> (i32, i32) {
    %c0_i32 = arith.constant 0 : i32
    %c0_i32_0 = arith.constant 0 : i32
    %c0_i32_1 = arith.constant 0 : i32
    return %c0_i32, %c0_i32_0 : i32, i32
  }
  func.func @transform_3(%arg0: i32, %arg1: i32, %arg2: i32) -> (i32, i32) {
    %c0_i32 = arith.constant 0 : i32
    %c0_i32_0 = arith.constant 0 : i32
    %c0_i32_1 = arith.constant 0 : i32
    return %c0_i32, %c0_i32_0 : i32, i32
  }
  func.func @transform_4(%arg0: i32, %arg1: i32, %arg2: i32) -> (i32, i32) {
    %c0_i32 = arith.constant 0 : i32
    %c0_i32_0 = arith.constant 0 : i32
    %c0_i32_1 = arith.constant 0 : i32
    return %c0_i32, %c0_i32_0 : i32, i32
  }
  func.func @transform_5(%arg0: i32, %arg1: i32, %arg2: i32) -> (i32, i32) {
    %c0_i32 = arith.constant 0 : i32
    %c0_i32_0 = arith.constant 0 : i32
    %c0_i32_1 = arith.constant 0 : i32
    return %c0_i32, %c0_i32_0 : i32, i32
  }
  func.func @transform_6(%arg0: i32, %arg1: i32, %arg2: i32) -> (i32, i32) {
    %c0_i32 = arith.constant 0 : i32
    %c0_i32_0 = arith.constant 0 : i32
    %c0_i32_1 = arith.constant 0 : i32
    return %c0_i32, %c0_i32_0 : i32, i32
  }
  func.func @transform_7(%arg0: i32, %arg1: i32, %arg2: i32) -> (i32, i32) {
    %c0_i32 = arith.constant 0 : i32
    %c0_i32_0 = arith.constant 0 : i32
    %c0_i32_1 = arith.constant 0 : i32
    return %c0_i32, %c0_i32_0 : i32, i32
  }
  func.func @transform_8(%arg0: i32, %arg1: i32, %arg2: i32) -> (i32, i32) {
    %c0_i32 = arith.constant 0 : i32
    %c0_i32_0 = arith.constant 0 : i32
    %c0_i32_1 = arith.constant 0 : i32
    return %c0_i32, %c0_i32_0 : i32, i32
  }
  func.func @transform_9(%arg0: i32, %arg1: i32, %arg2: i32) -> (i32, i32) {
    %c0_i32 = arith.constant 0 : i32
    %c0_i32_0 = arith.constant 0 : i32
    %c0_i32_1 = arith.constant 0 : i32
    return %c0_i32, %c0_i32_0 : i32, i32
  }
  func.func @transform_10(%arg0: i32, %arg1: i32, %arg2: i32) -> (i32, i32, i32) {
    %c0_i32 = arith.constant 0 : i32
    %c0_i32_0 = arith.constant 0 : i32
    return %arg0, %arg1, %c0_i32 : i32, i32, i32
  }
}

</mosaic_0001>

<bundles_post_ra>
// kernel: tpu_custom_call.1
= control target key start
LH: loop header
LB: loop body
LE: loop exit
PB: predicated region body
PF: predicated region fallthrough
CT: control target
= control target key end

     0   :  { %s4709_s0 = inlined_call_operand.hbm [shape: f32[2,256,128], index: 0, kind: input, shape index: {}]   ;;  %s4710_s1 = inlined_call_operand.hbm [shape: f32[2,256,128], index: 1, kind: input, shape index: {}]   ;;  %s4711_s2 = inlined_call_operand.hbm [shape: f32[128,128], index: 2, kind: input, shape index: {}]   ;;  %s4712_s3 = inlined_call_operand.vmem [shape: f32[1,128], index: 3, kind: input, shape index: {}]   ;;  %s4713_s4 = inlined_call_operand.hbm [shape: f32[128,128], index: 4, kind: input, shape index: {}]   ;;  %s4714_s5 = inlined_call_operand.vmem [shape: f32[1,128], index: 5, kind: input, shape index: {}]   ;;  %s4715_s6 = inlined_call_operand.hbm [shape: f32[128,128], index: 6, kind: input, shape index: {}]   ;;  %s4716_s7 = inlined_call_operand.hbm [shape: f32[128,128], index: 7, kind: input, shape index: {}]   ;;  %s4717_s8 = inlined_call_operand.hbm [shape: f32[128,128], index: 8, kind: input, shape index: {}]   ;;  %s4718_s9 = inlined_call_operand.hbm [shape: f32[128,128], index: 9, kind: input, shape index: {}]   ;;  %s4719_s10 = inlined_call_operand.hbm [shape: f32[2,256,128], index: 10, kind: output, shape index: {}]  }
   0x1   :  { %4738 = sst [smem:[#allocation38_spill]] %s4709_s0 }
   0x2   :  { %4739 = sst [smem:[#allocation39_spill]] %s4710_s1 }
   0x3   :  { %4740 = sst [smem:[#allocation40_spill]] %s4711_s2 }
   0x4   :  { %4741 = sst [smem:[#allocation41_spill]] %s4712_s3 }
   0x5   :  { %4742 = sst [smem:[#allocation42_spill]] %s4713_s4 }
   0x6   :  { %4743 = sst [smem:[#allocation43_spill]] %s4714_s5 }
   0x7   :  { %4744 = sst [smem:[#allocation44_spill]] %s4715_s6 }
   0x8   :  { %4745 = sst [smem:[#allocation45_spill]] %s4716_s7 }
   0x9   :  { %4746 = sst [smem:[#allocation46_spill]] %s4717_s8 }
   0xa   :  { %4747 = sst [smem:[#allocation47_spill]] %s4718_s9 }
   0xb   :  { %4748 = sst [smem:[#allocation48_spill]] %s4719_s10 }
   0xc   :  { %15 = vsyncpa [#allocation7], 0 }
   0xd   :  { %17 = vsyncpa [#allocation7 + $0x1], 0 }
   0xe   :  { %18 = vsyncpa [#allocation10], 0 }
   0xf   :  { %20 = vsyncpa [#allocation10 + $0x1], 0 }
  0x10   :  { %21 = vsyncpa [#allocation13], 0 }
  0x11   :  { %22 = vsyncpa [#allocation16], 0 }
  0x12   :  { %23 = vsyncpa [#allocation19], 0 }
  0x13   :  { %24 = vsyncpa [#allocation8], 0 }
  0x14   :  { %26 = vsyncpa [#allocation8 + $0x1], 0  ;;  %s3755_s13 = smov 0   ;;  %s3757_s14 = smov 0  }
  0x15   :  { %s3759_s15 = smov 0   ;;  %s3761_s16 = smov 0  }
  0x16   :  { %s3763_s17 = smov 0   ;;  %s3765_s18 = smov 0  }
  0x17   :  { %s3767_s19 = smov 0   ;;  %s3769_s20 = smov 0  }
  0x18   :  { %s3771_s21 = smov 0   ;;  %s3773_s22 = smov 0  }
  0x19   :  { %s3775_s23 = smov 0   ;;  %s3777_s24 = smov 0  }
  0x1a   :  { %s3779_s25 = smov 0  }
  0x1b LB: > { %4749 = sst [smem:[#allocation28_spill]] %s3633_s13  ;;  %s3821_s26 = sadd.s32 4294967295, %s3681_s25   ;;  %s3681_s25 = sphi %s3779_s25, %s32_s25   ;;  %s3677_s24 = sphi %s3777_s24, %s4823_s24   ;;  %s3673_s23 = sphi %s3775_s23, %s4822_s23   ;;  %s3669_s22 = sphi %s3773_s22, %s4821_s22   ;;  %s3665_s21 = sphi %s3771_s21, %s4820_s21   ;;  %s3661_s20 = sphi %s3769_s20, %s4819_s20   ;;  %s3657_s19 = sphi %s3767_s19, %s4818_s19   ;;  %s3653_s18 = sphi %s3765_s18, %s4817_s18   ;;  %s3649_s17 = sphi %s3763_s17, %s4816_s17   ;;  %s3645_s16 = sphi %s3761_s16, %s4815_s16   ;;  %s3641_s15 = sphi %s3759_s15, %s4814_s15   ;;  %s3637_s14 = sphi %s3757_s14, %s4809_s14   ;;  %s3633_s13 = sphi %s3755_s13, %s4808_s13  }
  0x1c   : > { %4750 = sst [smem:[#allocation29_spill]] %s3637_s14  ;;  %p2551_p0 = scmp.ge.s32.totalorder %s3681_s25, 1 }
  0x1d   : > { %4751 = sst [smem:[#allocation30_spill]] %s3641_s15  ;;  %p4725_p1 = scmp.eq.s32.totalorder %s3821_s26, 0 }
  0x1e   : > { %4752 = sst [smem:[#allocation31_spill]] %s3657_s19  ;;  %p308_p2 = scmp.lt.s32.totalorder %s3681_s25, 9 }
  0x1f   : > { %4753 = sst [smem:[#allocation32_spill]] %s3661_s20  ;;  %s3683_s28 = smov [#allocation11]  }
  0x20   : > { %4754 = sst [smem:[#allocation33_spill]] %s3665_s21  ;;  %p3826_p3 = pnand %p2551_p0, %p308_p2 }
  0x21   : > { %s320_s29 = sshll.u32 %s3683_s28, 4  ;;  %s3684_s11 = smov [#allocation12]   ;;  %s3830_s29 = int_to_ptr.vmem [resolvable:$true] %s320_s29 }
  0x22   : > { %s4755_s27 = scalar_select %p3826_p3, 1, 0 }
  0x23   : > { %p3033_p4 = pneg %p3826_p3  ;;  %s336_s12 = sshll.u32 %s3684_s11, 4  ;;  %s3840_s12 = int_to_ptr.vmem [resolvable:$true] %s336_s12 }
  0x24   : > { %4756 = sst [smem:[#allocation34_spill]] %s4755_s27  ;;  %s3685_s10 = smov [#allocation15]  }
  0x25   : > { %p3836_p5 = pnand %p3033_p4, %p4725_p1  ;;  %s3842_s21 = sshll.u32 %s3685_s10, 4  ;;  %s366_s21 = int_to_ptr.vmem [resolvable:$true] %s3842_s21 }
  0x26   : > { %s4758_s2 = sld [smem:[#allocation40_spill]] }
  0x27   : > { %p3852_p7 = pneg %p3836_p5 }
  0x2c   : > { %s3295_s28 = scalar_lea.hbm %s4758_s2, 2048 }
  0x2d   : > { %p3296_p6 = scmp.ne.s32.totalorder %s4758_s2, %s3295_s28  ;;  %p3302_p10 = scmp.lt.u32.totalorder %s3295_s28, %s4758_s2 }
  0x2f   : > { %p3298_p8 = pnand %p3852_p7, %p3296_p6 }
  0x31   : > { %p3299_p9 = pneg %p3298_p8 }
  0x33   : > { %p3304_p11 = pnand %p3302_p10, %p3299_p9 }
  0x35   : > { %3307 = shalt.err (!%p3304_p11)
}
  0x36   : > { %s3308_s3 = scalar_lea.vmem %s3830_s29, 2048  ;;  %p3316_p2 = scmp.lt.s32.totalorder %s3830_s29, %s3830_s29 }
  0x37   : > { %p3309_p12 = scmp.ne.s32.totalorder %s3830_s29, %s3308_s3  ;;  %p3317_p4 = scmp.lt.s32.totalorder %s3308_s3, %s3308_s3 }
  0x39   : > { %p3311_p13 = pnand %p3309_p12, %p3852_p7  ;;  %p3318_p6 = por %p3317_p4, %p3316_p2 }
  0x3b   : > { %p3312_p0 = pneg %p3311_p13 }
  0x3d   : > { %p3319_p8 = pnand %p3318_p6, %p3312_p0 }
  0x3f   : > { %3322 = shalt.err (!%p3319_p8)
}
  0x40   : > { %s4727_s5 = smov 128   ;;  %s4729_s19 = smov 8  }
  0x41   : > { %3036 = dma.hbm_to_vmem [thread:$0]  (!%p3836_p5), %s4758_s2, 2048, %s3830_s29, [#allocation10], %s4727_s5, %s4727_s5, %s4729_s19  }
  0x42   : > { %s4760_s4 = sld [smem:[#allocation42_spill]] }
  0x48   : > { %s3323_s3 = scalar_lea.hbm %s4760_s4, 2048 }
  0x49   : > { %p3324_p9 = scmp.ne.s32.totalorder %s4760_s4, %s3323_s3  ;;  %p3330_p12 = scmp.lt.u32.totalorder %s3323_s3, %s4760_s4 }
  0x4b   : > { %p3326_p10 = pnand %p3324_p9, %p3852_p7 }
  0x4d   : > { %p3327_p11 = pneg %p3326_p10 }
  0x4f   : > { %p3332_p13 = pnand %p3330_p12, %p3327_p11 }
  0x51   : > { %3335 = shalt.err (!%p3332_p13)
}
  0x52   : > { %s3336_s29 = scalar_lea.vmem %s3840_s12, 2048  ;;  %p3344_p6 = scmp.lt.s32.totalorder %s3840_s12, %s3840_s12 }
  0x53   : > { %p3337_p0 = scmp.ne.s32.totalorder %s3840_s12, %s3336_s29  ;;  %p3345_p8 = scmp.lt.s32.totalorder %s3336_s29, %s3336_s29 }
  0x55   : > { %p3339_p2 = pnand %p3337_p0, %p3852_p7  ;;  %p3346_p9 = por %p3345_p8, %p3344_p6 }
  0x57   : > { %p3340_p4 = pneg %p3339_p2 }
  0x59   : > { %p3347_p10 = pnand %p3346_p9, %p3340_p4 }
  0x5b   : > { %3350 = shalt.err (!%p3347_p10)
}
  0x5c   : > { %3039 = dma.hbm_to_vmem [thread:$0]  (!%p3836_p5), %s4760_s4, 2048, %s3840_s12, [#allocation13], %s4727_s5, %s4727_s5, %s4729_s19  }
  0x5d   : > { %s4761_s7 = sld [smem:[#allocation45_spill]] }
  0x63   : > { %s3351_s20 = scalar_lea.hbm %s4761_s7, 2048 }
  0x64   : > { %p3352_p11 = scmp.ne.s32.totalorder %s4761_s7, %s3351_s20  ;;  %p3358_p0 = scmp.lt.u32.totalorder %s3351_s20, %s4761_s7 }
  0x66   : > { %p3354_p12 = pnand %p3352_p11, %p3852_p7 }
  0x68   : > { %p3355_p13 = pneg %p3354_p12 }
  0x6a   : > { %p3360_p2 = pnand %p3358_p0, %p3355_p13 }
  0x6c   : > { %3363 = shalt.err (!%p3360_p2)
}
  0x6d   : > { %s3364_s29 = scalar_lea.vmem %s366_s21, 2048  ;;  %p3372_p9 = scmp.lt.s32.totalorder %s366_s21, %s366_s21 }
  0x6e   : > { %p3365_p4 = scmp.ne.s32.totalorder %s366_s21, %s3364_s29  ;;  %p3373_p10 = scmp.lt.s32.totalorder %s3364_s29, %s3364_s29 }
  0x70   : > { %p3367_p6 = pnand %p3365_p4, %p3852_p7  ;;  %p3374_p1 = por %p3373_p10, %p3372_p9 }
  0x72   : > { %p3368_p8 = pneg %p3367_p6 }
  0x74   : > { %p3375_p3 = pnand %p3374_p1, %p3368_p8 }
  0x76   : > { %3378 = shalt.err (!%p3375_p3)
}
  0x77   : > { %3045 = dma.hbm_to_vmem [thread:$0]  (!%p3836_p5), %s4761_s7, 2048, %s366_s21, [#allocation16], %s4727_s5, %s4727_s5, %s4729_s19  }
  0x78   : > { %s3688_s13 = smov [#allocation14]   ;;  %s3689_s15 = smov [#allocation17]  }
  0x79   : > { %s352_s14 = sshll.u32 %s3688_s13, 4  ;;  %s378_s20 = sshll.u32 %s3689_s15, 4  ;;  %s353_s14 = int_to_ptr.vmem [resolvable:$true] %s352_s14  ;;  %s379_s20 = int_to_ptr.vmem [resolvable:$true] %s378_s20 }
  0x7a   : > { %s4762_s6 = sld [smem:[#allocation44_spill]] }
  0x80   : > { %s3379_s10 = scalar_lea.hbm %s4762_s6, 2048 }
  0x81   : > { %p3380_p1 = scmp.ne.s32.totalorder %s4762_s6, %s3379_s10  ;;  %p3386_p12 = scmp.lt.u32.totalorder %s3379_s10, %s4762_s6 }
  0x83   : > { %p3382_p3 = pnand %p3380_p1, %p3852_p7 }
  0x85   : > { %p3383_p11 = pneg %p3382_p3 }
  0x87   : > { %p3388_p13 = pnand %p3386_p12, %p3383_p11 }
  0x89   : > { %3391 = shalt.err (!%p3388_p13)
}
  0x8a   : > { %s3392_s21 = scalar_lea.vmem %s353_s14, 2048  ;;  %p3400_p6 = scmp.lt.s32.totalorder %s353_s14, %s353_s14 }
  0x8b   : > { %p3393_p0 = scmp.ne.s32.totalorder %s353_s14, %s3392_s21  ;;  %p3401_p8 = scmp.lt.s32.totalorder %s3392_s21, %s3392_s21 }
  0x8d   : > { %p3395_p2 = pnand %p3393_p0, %p3852_p7  ;;  %p3402_p9 = por %p3401_p8, %p3400_p6 }
  0x8f   : > { %p3396_p4 = pneg %p3395_p2 }
  0x91   : > { %p3403_p10 = pnand %p3402_p9, %p3396_p4 }
  0x93   : > { %3406 = shalt.err (!%p3403_p10)
}
  0x94   : > { %3042 = dma.hbm_to_vmem [thread:$0]  (!%p3836_p5), %s4762_s6, 2048, %s353_s14, [#allocation13], %s4727_s5, %s4727_s5, %s4729_s19  }
  0x95   : > { %s4763_s8 = sld [smem:[#allocation46_spill]] }
  0x9b   : > { %s3407_s28 = scalar_lea.hbm %s4763_s8, 2048 }
  0x9c   : > { %p3408_p1 = scmp.ne.s32.totalorder %s4763_s8, %s3407_s28  ;;  %p3414_p12 = scmp.lt.u32.totalorder %s3407_s28, %s4763_s8 }
  0x9e   : > { %p3410_p3 = pnand %p3408_p1, %p3852_p7 }
  0xa0   : > { %p3411_p11 = pneg %p3410_p3 }
  0xa2   : > { %p3416_p13 = pnand %p3414_p12, %p3411_p11 }
  0xa4   : > { %3419 = shalt.err (!%p3416_p13)
}
  0xa5   : > { %s3420_s12 = scalar_lea.vmem %s379_s20, 2048  ;;  %p3428_p6 = scmp.lt.s32.totalorder %s379_s20, %s379_s20 }
  0xa6   : > { %p3421_p0 = scmp.ne.s32.totalorder %s379_s20, %s3420_s12  ;;  %p3429_p8 = scmp.lt.s32.totalorder %s3420_s12, %s3420_s12 }
  0xa8   : > { %p3423_p2 = pnand %p3421_p0, %p3852_p7  ;;  %p3430_p9 = por %p3429_p8, %p3428_p6 }
  0xaa   : > { %p3424_p4 = pneg %p3423_p2 }
  0xac   : > { %p3431_p10 = pnand %p3430_p9, %p3424_p4 }
  0xae   : > { %3434 = shalt.err (!%p3431_p10)
}
  0xaf   : > { %3048 = dma.hbm_to_vmem [thread:$0]  (!%p3836_p5), %s4763_s8, 2048, %s379_s20, [#allocation16], %s4727_s5, %s4727_s5, %s4729_s19  }
  0xb0   : > { %s3690_s2 = smov [#allocation18]   ;;  %s4764_s9 = sld [smem:[#allocation47_spill]] }
  0xb1   : > { %s391_s1 = sshll.u32 %s3690_s2, 4  ;;  %s392_s1 = int_to_ptr.vmem [resolvable:$true] %s391_s1 }
  0xb6   : > { %s3435_s28 = scalar_lea.hbm %s4764_s9, 2048 }
  0xb7   : > { %p3436_p1 = scmp.ne.s32.totalorder %s4764_s9, %s3435_s28  ;;  %p3442_p12 = scmp.lt.u32.totalorder %s3435_s28, %s4764_s9 }
  0xb9   : > { %p3438_p3 = pnand %p3436_p1, %p3852_p7 }
  0xbb   : > { %p3439_p11 = pneg %p3438_p3 }
  0xbd   : > { %p3444_p13 = pnand %p3442_p12, %p3439_p11 }
  0xbf   : > { %3447 = shalt.err (!%p3444_p13)
}
  0xc0   : > { %s3448_s20 = scalar_lea.vmem %s392_s1, 2048  ;;  %p3456_p6 = scmp.lt.s32.totalorder %s392_s1, %s392_s1 }
  0xc1   : > { %p3449_p0 = scmp.ne.s32.totalorder %s392_s1, %s3448_s20  ;;  %p3457_p8 = scmp.lt.s32.totalorder %s3448_s20, %s3448_s20 }
  0xc3   : > { %p3451_p2 = pnand %p3449_p0, %p3852_p7  ;;  %p3458_p9 = por %p3457_p8, %p3456_p6 }
  0xc5   : > { %p3452_p4 = pneg %p3451_p2 }
  0xc7   : > { %p3459_p10 = pnand %p3458_p9, %p3452_p4 }
  0xc9   : > { %3462 = shalt.err (!%p3459_p10)
}
  0xca   : > { %3051 = dma.hbm_to_vmem [thread:$0]  (!%p3836_p5), %s4764_s9, 2048, %s392_s1, [#allocation19], %s4727_s5, %s4727_s5, %s4729_s19  }
  0xcb   : > { %s44_s27 = sadd.s32 1, %s3669_s22  ;;  %s47_s30 = sadd.s32 1, %s3673_s23 }
  0xcc   : > { %p45_p7 = scmp.ge.s32.totalorder %s44_s27, 2  ;;  %s2550_s21 = sadd.s32 4294967294, %s3681_s25  }
  0xcd   : > { %s51_s2 = sadd.s32 1, %s3677_s24  ;;  %p67_p1 = scmp.ne.s32.totalorder %s3653_s18, %s3649_s17 }
  0xce   : > { %s4825_s27 = smov (%p45_p7, %s44_s27), 0  ;;  %s4827_s30 = smov (!%p45_p7, %s47_s30), %s3673_s23 }
  0xcf   : > { %4765 = sst [smem:[#allocation35_spill]] %s4825_s27  ;;  %p4733_p5 = scmp.eq.s32.totalorder %s3681_s25, 0 }
  0xd0   : > { %p49_p3 = scmp.ge.s32.totalorder %s4827_s30, 2  ;;  %p73_p11 = scmp.ne.s32.totalorder %s3649_s17, %s3645_s16 }
  0xd1   : > { %s60_s1 = sadd.s32 1, %s3653_s18  ;;  %p4005_p12 = por %p4733_p5, %p67_p1 }
  0xd2   : > { %s4829_s30 = smov (%p49_p3, %s4827_s30), 0  ;;  %s4831_s2 = smov (!%p49_p3, %s51_s2), %s3677_s24 }
  0xd3   : > { %4767 = sst [smem:[#allocation36_spill]] %s4829_s30  ;;  %p4768_p13 = scmp.eq.s32.totalorder %s3821_s26, 0 }
  0xd4   : > { %s84_s28 = ssub.s32 %s3669_s22, %s4825_s27  ;;  %p53_p2 = scmp.ge.s32.totalorder %s4831_s2, 2 }
  0xd5   : > { %p4017_p0 = por %p4768_p13, %p73_p11  ;;  %p295_p4 = scmp.eq.s32.totalorder %s3821_s26, 7 }
  0xd6   : > { %s56_s11 = ssub.s32 %s3673_s23, %s4829_s30  ;;  %p301_p6 = scmp.eq.s32.totalorder %s2550_s21, 7 }
  0xd7   : > { %s4833_s2 = smov (%p53_p2, %s4831_s2), 0  ;;  %p4031_p8 = por %p295_p4, %p67_p1 }
  0xd8   : > { %4770 = sst [smem:[#allocation37_spill]] %s4833_s2  ;;  %p4038_p9 = por %p301_p6, %p73_p11 }
  0xd9   : > { %s4771_s10 = scalar_select %p4031_p8, 1, 0 }
  0xda   : > { %s4772_s3 = scalar_select %p4038_p9, 1, 0 }
  0xdb   : > { %s55_s29 = ssub.s32 %s3677_s24, %s4833_s2  ;;  %s405_s20 = sand.u32 1, %s3653_s18  }
  0xdc   : > { %s57_s12 = sor.u32 %s56_s11, %s55_s29  ;;  %p4732_p10 = scmp.lt.s32.totalorder %s3681_s25, 8 }
  0xdd   : > { %p58_p7 = scmp.eq.s32.totalorder %s57_s12, 0  ;;  %s4046_s14 = sor.u32 %s84_s28, %s55_s29 }
  0xde   : > { %s2559_s21 = sshll.u32 %s405_s20, 7  ;;  %s2560_s19 = sshll.u32 %s3673_s23, 4 }
  0xdf   : > { %s4049_s5 = scalar_select %p58_p7, %s3653_s18, %s60_s1  }
  0xe0   : > { %s2561_s4 = sshll.u32 %s3677_s24, 5  ;;  %s409_s6 = scalar_lea.vmem [#allocation6], %s2559_s21 }
  0xe1   : > { %s418_s7 = sshll.u32 %s409_s6, 4  ;;  %s415_s8 = sadd.s32 %s2561_s4, %s2560_s19  ;;  %s4053_s7 = int_to_ptr.vmem [resolvable:$true] %s418_s7 }
  0xe2   : > { %s2562_s9 = sshll.u32 %s415_s8, 7  ;;  %p4059_p1 = pnand %p4732_p10, %p4005_p12 }
  0xe3   : > { %s4774_s0 = sld [smem:[#allocation38_spill]]  ;;  %s2564_s6 = sshll.u32 %s3669_s22, 4 }
  0xe4   : > { %s4069_s19 = sadd.s32 %s2564_s6, %s2561_s4  ;;  %s4071_s8 = scalar_lea.sflag [#allocation7], %s405_s20 }
  0xe5   : > { %p3465_p11 = pneg %p4059_p1 }
  0xe9   : > { %s4066_s1 = scalar_lea.hbm %s4774_s0, %s2562_s9  ;;  %s3468_s12 = scalar_lea.hbm %s4774_s0, 8192 }
  0xea   : > { %s3463_s13 = scalar_lea.hbm %s4066_s1, 2048  ;;  %p3469_p2 = scmp.lt.u32.totalorder %s4066_s1, %s4774_s0 }
  0xeb   : > { %p3464_p3 = scmp.ne.s32.totalorder %s4066_s1, %s3463_s13  ;;  %p3470_p4 = scmp.lt.u32.totalorder %s3468_s12, %s3463_s13 }
  0xec   : > { %p3472_p7 = scmp.lt.u32.totalorder %s3463_s13, %s4066_s1 }
  0xed   : > { %p3466_p12 = pnand %p3465_p11, %p3464_p3  ;;  %p3471_p6 = por %p3470_p4, %p3469_p2 }
  0xef   : > { %p3467_p13 = pneg %p3466_p12  ;;  %p3473_p10 = por %p3472_p7, %p3471_p6 }
  0xf1   : > { %p3474_p5 = pnand %p3473_p10, %p3467_p13 }
  0xf3   : > { %3477 = shalt.err (!%p3474_p5)
}
  0xf4   : > { %s3478_s4 = scalar_lea.vmem %s4053_s7, 2048  ;;  %s3691_s20 = smov [#allocation6]  }
  0xf5   : > { %p3479_p3 = scmp.ne.s32.totalorder %s4053_s7, %s3478_s4  ;;  %s3483_s28 = sshll.u32 %s3691_s20, 4  ;;  %s3484_s28 = int_to_ptr.vmem [resolvable:$false] %s3483_s28 }
  0xf6   : > { %s3485_s6 = scalar_lea.vmem %s3484_s28, 4096  ;;  %p3486_p8 = scmp.lt.s32.totalorder %s4053_s7, %s3484_s28 }
  0xf7   : > { %p3481_p12 = pnand %p3479_p3, %p3465_p11  ;;  %p3487_p2 = scmp.lt.s32.totalorder %s3485_s6, %s3478_s4 }
  0xf9   : > { %p3482_p9 = pneg %p3481_p12  ;;  %p3488_p4 = por %p3487_p2, %p3486_p8 }
  0xfb   : > { %p3489_p6 = pnand %p3488_p4, %p3482_p9 }
  0xfd   : > { %3492 = shalt.err (!%p3489_p6)
}
  0xfe   : > { %s4775_s13 = smov 8   ;;  %s4776_s29 = smov 128  }
  0xff   : > { %s4777_s9 = sld [smem:[#allocation30_spill]]  ;;  %s4778_s12 = sld [smem:[#allocation29_spill]] }
 0x100   : > { %s4779_s21 = sld [smem:[#allocation28_spill]]  ;;  %p86_p5 = scmp.eq.s32.totalorder %s4046_s14, 0 }
 0x101   : > { %3055 = dma.hbm_to_vmem [thread:$0]  (!%p4059_p1), %s4066_s1, 2048, %s4053_s7, %s4071_s8, %s4776_s29, %s4776_s29, %s4775_s13  }
 0x102   : > { %s2566_s2 = sshll.u32 %s4069_s19, 7  ;;  %p4780_p9 = scmp.eq.s32.totalorder %s3681_s25, 0 }
 0x103   : > { %s428_s20 = sand.u32 1, %s3681_s25   ;;  %s4781_s30 = sld [smem:[#allocation39_spill]] }
 0x104   : > { %p4782_p13 = scmp.eq.s32.totalorder %s3821_s26, 0  ;;  %p4784_p7 = scmp.lt.s32.totalorder %s3681_s25, 8 }
 0x105   : > { %s88_s11 = sadd.s32 1, %s4777_s9  ;;  %p95_p8 = scmp.ne.s32.totalorder %s4777_s9, %s4778_s12 }
 0x106   : > { %s4108_s4 = scalar_select %p86_p5, %s4777_s9, %s88_s11  }
 0x107   : > { %p97_p10 = por %p95_p8, %p4780_p9  ;;  %p101_p11 = scmp.ne.s32.totalorder %s4778_s12, %s4779_s21 }
 0x108   : > { %s430_s28 = sand.u32 1, %s4777_s9   ;;  %s4135_s8 = scalar_lea.sflag [#allocation10], %s428_s20 }
 0x109   : > { %s4119_s27 = scalar_lea.hbm %s4781_s30, %s2566_s2  ;;  %p4123_p1 = por %p101_p11, %p4782_p13 }
 0x10a   : > { %s2563_s14 = sshll.u32 %s430_s28, 7  ;;  %p4129_p3 = pnand %p4784_p7, %p97_p10 }
 0x10b   : > { %s4783_s7 = scalar_select %p4123_p1, 1, 0 }
 0x10c   : > { %s432_s0 = scalar_lea.vmem [#allocation9], %s2563_s14  ;;  %s3493_s9 = scalar_lea.hbm %s4119_s27, 2048 }
 0x10d   : > { %s441_s19 = sshll.u32 %s432_s0, 4  ;;  %p3494_p12 = scmp.ne.s32.totalorder %s4119_s27, %s3493_s9  ;;  %s4133_s19 = int_to_ptr.vmem [resolvable:$true] %s441_s19 }
 0x10e   : > { %p3495_p2 = pneg %p4129_p3  ;;  %s3498_s2 = scalar_lea.hbm %s4781_s30, 8192 }
 0x10f   : > { %p3499_p5 = scmp.lt.u32.totalorder %s4119_s27, %s4781_s30  ;;  %p3500_p8 = scmp.lt.u32.totalorder %s3498_s2, %s3493_s9 }
 0x110   : > { %p3496_p4 = pnand %p3495_p2, %p3494_p12  ;;  %p3502_p10 = scmp.lt.u32.totalorder %s3493_s9, %s4119_s27 }
 0x111   : > { %p3501_p9 = por %p3500_p8, %p3499_p5 }
 0x112   : > { %p3497_p6 = pneg %p3496_p4 }
 0x113   : > { %p3503_p11 = por %p3502_p10, %p3501_p9 }
 0x115   : > { %p3504_p13 = pnand %p3503_p11, %p3497_p6 }
 0x117   : > { %3507 = shalt.err (!%p3504_p13)
}
 0x118   : > { %s3508_s20 = scalar_lea.vmem %s4133_s19, 2048  ;;  %s3692_s6 = smov [#allocation9]  }
 0x119   : > { %p3509_p7 = scmp.ne.s32.totalorder %s4133_s19, %s3508_s20  ;;  %s3513_s14 = sshll.u32 %s3692_s6, 4  ;;  %s3514_s14 = int_to_ptr.vmem [resolvable:$false] %s3513_s14 }
 0x11a   : > { %s3515_s0 = scalar_lea.vmem %s3514_s14, 4096  ;;  %p3516_p1 = scmp.lt.s32.totalorder %s4133_s19, %s3514_s14 }
 0x11b   : > { %p3511_p12 = pnand %p3509_p7, %p3495_p2  ;;  %p3517_p5 = scmp.lt.s32.totalorder %s3515_s0, %s3508_s20 }
 0x11d   : > { %p3512_p4 = pneg %p3511_p12  ;;  %p3518_p8 = por %p3517_p5, %p3516_p1 }
 0x11f   : > { %p3519_p9 = pnand %p3518_p8, %p3512_p4 }
 0x121   : > { %3522 = shalt.err (!%p3519_p9)
}
 0x122   : > { %3058 = dma.hbm_to_vmem [thread:$0]  (!%p4129_p3), %s4119_s27, 2048, %s4133_s19, %s4135_s8, %s4776_s29, %s4776_s29, %s4775_s13  }
 0x123   : > { %s4786_s9 = sld [smem:[#allocation34_spill]] }
 0x129   : > { %p4787_p2 = scmp.ne.s32.totalorder %s4786_s9, 0 }
 0x12a   : > { %s4169_s12 = sand.u32 (!%p4787_p2), 1, %s3649_s17  }
 0x12b   : > { %453 = sbr.rel (%p4787_p2) target bundleno = 2502 (0x9c6), region = 60  ;;  %s2568_s21 = sshll.u32 (!%p4787_p2), %s4169_s12, 7 }
 0x12c   : > { %s456_s2 = scalar_lea.sflag (!%p4787_p2), [#allocation7], %s4169_s12  ;;  %s4173_s11 = scalar_lea.vmem (!%p4787_p2), [#allocation6], %s2568_s21 }
 0x132   : > { %3604 = dma.done.wait (%p4017_p0), %s456_s2, 2048  }
 0x133   : > { %3606 = vsyncadd (%p4017_p0), %s456_s2, 4294965248  ;;  %s4788_s27 = sld [smem:[#allocation29_spill]]  ;;  %s464_s13 = sand.u32 1, %s3821_s26  }
 0x134   : > { %s465_s19 = scalar_lea.sflag [#allocation10], %s464_s13  ;;  %p4789_p1 = scmp.ne.s32.totalorder %s4783_s7, 0 }
 0x139   : > { %s466_s29 = sand.u32 1, %s4788_s27  }
 0x13a   : > { %s2569_s1 = sshll.u32 %s466_s29, 7 }
 0x13b   : > { %s4181_s8 = scalar_lea.vmem [#allocation9], %s2569_s1 }
 0x13c   : > { %3608 = dma.done.wait (%p4789_p1), %s465_s19, 2048  }
 0x13d   : > { %3610 = vsyncadd (%p4789_p1), %s465_s19, 4294965248  ;;  %p4790_p3 = scmp.eq.s32.totalorder %s3821_s26, 0 }
 0x13f   : > { %3612 = dma.done.wait (%p4790_p3), [#allocation10], 2048   ;;  %p4791_p6 = pmov %p4790_p3 }
 0x140   : > { %p4792_p0 = pmov %p4790_p3 }
 0x141   : > { %3614 = vsyncadd (%p4791_p6), [#allocation10], 4294965248 }
 0x142   : > { %3616 = dma.done.wait (%p4792_p0), [#allocation13], 4096   ;;  %p4793_p10 = pmov %p4792_p0 }
 0x143   : > { %p4794_p11 = pmov %p4792_p0 }
 0x144   : > { %3618 = vsyncadd (%p4793_p10), [#allocation13], 4294963200 }
 0x145   : > { %3620 = dma.done.wait (%p4794_p11), [#allocation16], 4096   ;;  %p4795_p13 = pmov %p4792_p0 }
 0x146   : > { %p4796_p7 = pmov %p4792_p0 }
 0x147   : > { %3622 = vsyncadd (%p4795_p13), [#allocation16], 4294963200 }
 0x148   : > { %3624 = dma.done.wait (%p4796_p7), [#allocation19], 2048   ;;  %p4797_p12 = pmov %p4792_p0 }
 0x149   : > { %s4203_s15 = scalar_lea.vmem [#allocation20], %s2568_s21  ;;  %s4798_s7 = sld [smem:[#allocation31_spill]] }
 0x14a   : > { %3626 = vsyncadd (%p4797_p12), [#allocation19], 4294965248 }
 0x14f   : > { %p2577_p4 = scmp.ne.s32.totalorder %s4798_s7, 0 }
 0x150   : > { %vm542_vm0 = vcmask (!%p2577_p4), 7168   ;;  %v615_v0 = vld [vmem:[#allocation14] sm:$0xff] (!%p2577_p4)  ;;  %v616_v1 = vld [vmem:[#allocation14 + $0x8] sm:$0xff] (!%p2577_p4)  ;;  %v3693_v2 = vmov (!%p2577_p4), -1e+30   ;;  %v3694_v3 = vmov (!%p2577_p4), 0.0  }
 0x151   : > { %541 = sbr.rel (%p2577_p4) target bundleno = 595 (0x253), region = 96  ;;  %543 = vst.msk [vmem:[#allocation3] sm:$0xff] (!%p2577_p4), %vm542_vm0, %v3693_v2  ;;  %544 = vst.msk [vmem:[#allocation3 + $0x8] sm:$0xff] (!%p2577_p4), %vm542_vm0, %v3693_v2  ;;  %v631_v4 = vpack.c.bf16 (!%p2577_p4), %v616_v1, %v615_v0  ;;  %v617_v5 = vld [vmem:[#allocation14 + $0x10] sm:$0xff] (!%p2577_p4)  ;;  %v618_v6 = vld [vmem:[#allocation14 + $0x18] sm:$0xff] (!%p2577_p4) }
 0x152   : > { %545 = vst.msk [vmem:[#allocation3 + $0x10] sm:$0xff] (!%p2577_p4), %vm542_vm0, %v3693_v2  ;;  %546 = vst.msk [vmem:[#allocation3 + $0x18] sm:$0xff] (!%p2577_p4), %vm542_vm0, %v3693_v2  ;;  %v632_v7 = vpack.c.bf16 (!%p2577_p4), %v618_v6, %v617_v5  ;;  %v619_v8 = vld [vmem:[#allocation14 + $0x20] sm:$0xff] (!%p2577_p4)  ;;  %v620_v9 = vld [vmem:[#allocation14 + $0x28] sm:$0xff] (!%p2577_p4) }
 0x153   : > { %547 = vst.msk [vmem:[#allocation3 + $0x20] sm:$0xff] (!%p2577_p4), %vm542_vm0, %v3693_v2  ;;  %548 = vst.msk [vmem:[#allocation3 + $0x28] sm:$0xff] (!%p2577_p4), %vm542_vm0, %v3693_v2  ;;  %2715 = vmatprep.subr.bf16.mxu0 (!%p2577_p4), %v631_v4  ;;  %2971 = vmatprep.subr.bf16.mxu1 (!%p2577_p4), %v631_v4  ;;  %v633_v10 = vpack.c.bf16 (!%p2577_p4), %v620_v9, %v619_v8  ;;  %v621_v11 = vld [vmem:[#allocation14 + $0x30] sm:$0xff] (!%p2577_p4)  ;;  %v622_v12 = vld [vmem:[#allocation14 + $0x38] sm:$0xff] (!%p2577_p4) }
 0x154   : > { %549 = vst.msk [vmem:[#allocation3 + $0x30] sm:$0xff] (!%p2577_p4), %vm542_vm0, %v3693_v2  ;;  %550 = vst.msk [vmem:[#allocation3 + $0x38] sm:$0xff] (!%p2577_p4), %vm542_vm0, %v3693_v2  ;;  %2716 = vmatpush3.bf16.msra.mxu0 (!%p2577_p4), %v631_v4  ;;  %2979 = vmatpush3.bf16.msra.mxu1 (!%p2577_p4), %v631_v4  ;;  %v591_v13 = vld [vmem:[%s4173_s11] sm:$0xff] (!%p2577_p4)  ;;  %v592_v14 = vld [vmem:[%s4173_s11 + $0x8] sm:$0xff] (!%p2577_p4)  ;;  %v634_v19 = vpack.c.bf16 (!%p2577_p4), %v622_v12, %v621_v11 }
 0x155   : > { %551 = vst.msk [vmem:[#allocation3 + $0x40] sm:$0xff] (!%p2577_p4), %vm542_vm0, %v3693_v2  ;;  %552 = vst.msk [vmem:[#allocation3 + $0x48] sm:$0xff] (!%p2577_p4), %vm542_vm0, %v3693_v2  ;;  %2717 = vmatprep.subr.bf16.mxu0 (!%p2577_p4), %v632_v7  ;;  %2972 = vmatprep.subr.bf16.mxu1 (!%p2577_p4), %v632_v7  ;;  %v599_v15 = vld [vmem:[%s4173_s11 + $0x40] sm:$0xff] (!%p2577_p4)  ;;  %v600_v16 = vld [vmem:[%s4173_s11 + $0x48] sm:$0xff] (!%p2577_p4)  ;;  %v607_v17 = vpack.c.bf16 (!%p2577_p4), %v592_v14, %v591_v13 }
 0x156   : > { %553 = vst.msk [vmem:[#allocation3 + $0x50] sm:$0xff] (!%p2577_p4), %vm542_vm0, %v3693_v2  ;;  %554 = vst.msk [vmem:[#allocation3 + $0x58] sm:$0xff] (!%p2577_p4), %vm542_vm0, %v3693_v2  ;;  %v611_v18 = vpack.c.bf16 (!%p2577_p4), %v600_v16, %v599_v15  ;;  %v623_v20 = vld [vmem:[#allocation14 + $0x40] sm:$0xff] (!%p2577_p4)  ;;  %v624_v21 = vld [vmem:[#allocation14 + $0x48] sm:$0xff] (!%p2577_p4) }
 0x157   : > { %555 = vst.msk [vmem:[#allocation3 + $0x60] sm:$0xff] (!%p2577_p4), %vm542_vm0, %v3693_v2  ;;  %556 = vst.msk [vmem:[#allocation3 + $0x68] sm:$0xff] (!%p2577_p4), %vm542_vm0, %v3693_v2  ;;  %2731 = vmatprep.mubr.bf16.mxu0 (!%p2577_p4), %v607_v17  ;;  %v635_v22 = vpack.c.bf16 (!%p2577_p4), %v624_v21, %v623_v20  ;;  %v625_v23 = vld [vmem:[#allocation14 + $0x50] sm:$0xff] (!%p2577_p4)  ;;  %v626_v24 = vld [vmem:[#allocation14 + $0x58] sm:$0xff] (!%p2577_p4) }
 0x158   : > { %557 = vst.msk [vmem:[#allocation3 + $0x70] sm:$0xff] %vm542_vm0, %v3693_v2  ;;  %558 = vst.msk [vmem:[#allocation3 + $0x78] sm:$0xff] %vm542_vm0, %v3693_v2  ;;  %2718 = vmatpush3.bf16.msra.mxu0 %v632_v7  ;;  %2980 = vmatpush3.bf16.msra.mxu1 %v632_v7  ;;  %v636_v25 = vpack.c.bf16 %v626_v24, %v625_v23  ;;  %v627_v26 = vld [vmem:[#allocation14 + $0x60] sm:$0xff]  ;;  %v628_v27 = vld [vmem:[#allocation14 + $0x68] sm:$0xff] }
 0x159   : > { %559 = vst.msk [vmem:[#allocation4] sm:$0xff] %vm542_vm0, %v3694_v3  ;;  %560 = vst.msk [vmem:[#allocation4 + $0x8] sm:$0xff] %vm542_vm0, %v3694_v3  ;;  %2719 = vmatprep.subr.bf16.mxu0 %v633_v10  ;;  %2973 = vmatprep.subr.bf16.mxu1 %v633_v10  ;;  %v637_v28 = vpack.c.bf16 %v628_v27, %v627_v26  ;;  %v629_v29 = vld [vmem:[#allocation14 + $0x70] sm:$0xff]  ;;  %v630_v30 = vld [vmem:[#allocation14 + $0x78] sm:$0xff] }
 0x15a   : > { %561 = vst.msk [vmem:[#allocation4 + $0x10] sm:$0xff] %vm542_vm0, %v3694_v3  ;;  %562 = vst.msk [vmem:[#allocation4 + $0x18] sm:$0xff] %vm542_vm0, %v3694_v3  ;;  %2739 = vmatprep.mubr.bf16.mxu1 %v611_v18  ;;  %v638_v31 = vpack.c.bf16 %v630_v30, %v629_v29  ;;  %v593_v32 = vld [vmem:[%s4173_s11 + $0x10] sm:$0xff]  ;;  %v594_v33 = vld [vmem:[%s4173_s11 + $0x18] sm:$0xff] }
 0x15b   : > { %563 = vst.msk [vmem:[#allocation4 + $0x20] sm:$0xff] %vm542_vm0, %v3694_v3  ;;  %564 = vst.msk [vmem:[#allocation4 + $0x28] sm:$0xff] %vm542_vm0, %v3694_v3  ;;  %v601_v34 = vld [vmem:[%s4173_s11 + $0x50] sm:$0xff]  ;;  %v602_v35 = vld [vmem:[%s4173_s11 + $0x58] sm:$0xff]  ;;  %v608_v40 = vpack.c.bf16 %v594_v33, %v593_v32 }
 0x15c   : > { %565 = vst.msk [vmem:[#allocation4 + $0x30] sm:$0xff] %vm542_vm0, %v3694_v3  ;;  %566 = vst.msk [vmem:[#allocation4 + $0x38] sm:$0xff] %vm542_vm0, %v3694_v3  ;;  %2720 = vmatpush3.bf16.msra.mxu0 %v633_v10  ;;  %2981 = vmatpush3.bf16.msra.mxu1 %v633_v10  ;;  %v595_v36 = vld [vmem:[%s4173_s11 + $0x20] sm:$0xff]  ;;  %v596_v37 = vld [vmem:[%s4173_s11 + $0x28] sm:$0xff]  ;;  %v612_v41 = vpack.c.bf16 %v602_v35, %v601_v34 }
 0x15d   : > { %567 = vst.msk [vmem:[#allocation4 + $0x40] sm:$0xff] %vm542_vm0, %v3694_v3  ;;  %568 = vst.msk [vmem:[#allocation4 + $0x48] sm:$0xff] %vm542_vm0, %v3694_v3  ;;  %2721 = vmatprep.subr.bf16.mxu0 %v634_v19  ;;  %2974 = vmatprep.subr.bf16.mxu1 %v634_v19  ;;  %v603_v38 = vld [vmem:[%s4173_s11 + $0x60] sm:$0xff]  ;;  %v604_v39 = vld [vmem:[%s4173_s11 + $0x68] sm:$0xff]  ;;  %v609_v42 = vpack.c.bf16 %v596_v37, %v595_v36 }
 0x15e   : > { %569 = vst.msk [vmem:[#allocation4 + $0x50] sm:$0xff] %vm542_vm0, %v3694_v3  ;;  %570 = vst.msk [vmem:[#allocation4 + $0x58] sm:$0xff] %vm542_vm0, %v3694_v3  ;;  %v613_v43 = vpack.c.bf16 %v604_v39, %v603_v38  ;;  %v597_v44 = vld [vmem:[%s4173_s11 + $0x30] sm:$0xff]  ;;  %v598_v45 = vld [vmem:[%s4173_s11 + $0x38] sm:$0xff] }
 0x15f   : > { %571 = vst.msk [vmem:[#allocation4 + $0x60] sm:$0xff] %vm542_vm0, %v3694_v3  ;;  %572 = vst.msk [vmem:[#allocation4 + $0x68] sm:$0xff] %vm542_vm0, %v3694_v3  ;;  %v605_v46 = vld [vmem:[%s4173_s11 + $0x70] sm:$0xff]  ;;  %v606_v47 = vld [vmem:[%s4173_s11 + $0x78] sm:$0xff]  ;;  %v610_v48 = vpack.c.bf16 %v598_v45, %v597_v44 }
 0x160   : > { %573 = vst.msk [vmem:[#allocation4 + $0x70] sm:$0xff] %vm542_vm0, %v3694_v3  ;;  %574 = vst.msk [vmem:[#allocation4 + $0x78] sm:$0xff] %vm542_vm0, %v3694_v3  ;;  %2722 = vmatpush3.bf16.msra.mxu0 %v634_v19  ;;  %2982 = vmatpush3.bf16.msra.mxu1 %v634_v19  ;;  %v614_v49 = vpack.c.bf16 %v606_v47, %v605_v46 }
 0x161   : > { %575 = vst [vmem:[#allocation5] sm:$0xff] %v3694_v3  ;;  %576 = vst [vmem:[#allocation5 + $0x8] sm:$0xff] %v3694_v3  ;;  %2723 = vmatprep.subr.bf16.mxu0 %v635_v22  ;;  %2975 = vmatprep.subr.bf16.mxu1 %v635_v22 }
 0x162   : > { %577 = vst [vmem:[#allocation5 + $0x10] sm:$0xff] %v3694_v3  ;;  %578 = vst [vmem:[#allocation5 + $0x18] sm:$0xff] %v3694_v3 }
 0x163   : > { %579 = vst [vmem:[#allocation5 + $0x20] sm:$0xff] %v3694_v3  ;;  %580 = vst [vmem:[#allocation5 + $0x28] sm:$0xff] %v3694_v3 }
 0x164   : > { %581 = vst [vmem:[#allocation5 + $0x30] sm:$0xff] %v3694_v3  ;;  %582 = vst [vmem:[#allocation5 + $0x38] sm:$0xff] %v3694_v3  ;;  %2724 = vmatpush3.bf16.msra.mxu0 %v635_v22  ;;  %2983 = vmatpush3.bf16.msra.mxu1 %v635_v22 }
 0x165   : > { %583 = vst [vmem:[#allocation5 + $0x40] sm:$0xff] %v3694_v3  ;;  %584 = vst [vmem:[#allocation5 + $0x48] sm:$0xff] %v3694_v3  ;;  %2725 = vmatprep.subr.bf16.mxu0 %v636_v25  ;;  %2976 = vmatprep.subr.bf16.mxu1 %v636_v25 }
 0x166   : > { %585 = vst [vmem:[#allocation5 + $0x50] sm:$0xff] %v3694_v3  ;;  %586 = vst [vmem:[#allocation5 + $0x58] sm:$0xff] %v3694_v3 }
 0x167   : > { %587 = vst [vmem:[#allocation5 + $0x60] sm:$0xff] %v3694_v3  ;;  %588 = vst [vmem:[#allocation5 + $0x68] sm:$0xff] %v3694_v3 }
 0x168   : > { %589 = vst [vmem:[#allocation5 + $0x70] sm:$0xff] %v3694_v3  ;;  %590 = vst [vmem:[#allocation5 + $0x78] sm:$0xff] %v3694_v3  ;;  %2726 = vmatpush3.bf16.msra.mxu0 %v636_v25  ;;  %2984 = vmatpush3.bf16.msra.mxu1 %v636_v25 }
 0x169   : > { %2727 = vmatprep.subr.bf16.mxu0 %v637_v28  ;;  %2977 = vmatprep.subr.bf16.mxu1 %v637_v28 }
 0x16c   : > { %2728 = vmatpush3.bf16.msra.mxu0 %v637_v28  ;;  %2985 = vmatpush3.bf16.msra.mxu1 %v637_v28 }
 0x16d   : > { %2729 = vmatprep.subr.bf16.mxu0 %v638_v31  ;;  %2978 = vmatprep.subr.bf16.mxu1 %v638_v31 }
 0x170   : > { %2730 = vmatpush3.bf16.msra.mxu0 %v638_v31  ;;  %2986 = vmatpush3.bf16.msra.mxu1 %v638_v31 }
 0x173   : > { %2732 = vmatmul.mubr.bf16.vlgmr.msra.gmra.mrb[0].mxu0 %v608_v40  ;;  %2740 = vmatmul.mubr.bf16.vlgmr.msra.gmra.mrb[0].mxu1 %v612_v41 }
 0x174   : > { %2735 = vmatprep.mubr.bf16.mxu0 %v609_v42  ;;  %2743 = vmatprep.mubr.bf16.mxu1 %v613_v43 }
 0x17b   : > { %2736 = vmatmul.mubr.bf16.gmra.mrb[4].mxu0 %v610_v48  ;;  %2744 = vmatmul.mubr.bf16.gmra.mrb[4].mxu1 %v614_v49 }
 0x246   : > { %v2733_v50 = vpop.f32.mrb[0].mxu0  ;;  %v2741_v51 = vpop.f32.mrb[0].mxu1 }
 0x247   : > { %738 = vst [vmem:[#allocation2 + $0x10] sm:$0xff] %v2733_v50  ;;  %746 = vst [vmem:[#allocation2 + $0x50] sm:$0xff] %v2741_v51  ;;  %v673_v52 = vpop.f32.mrb[1].mxu0  ;;  %v705_v53 = vpop.f32.mrb[1].mxu1 }
 0x248   : > { %736 = vst [vmem:[#allocation2] sm:$0xff] %v673_v52  ;;  %744 = vst [vmem:[#allocation2 + $0x40] sm:$0xff] %v705_v53  ;;  %v2734_v54 = vpop.f32.mrb[2].mxu0  ;;  %v2742_v55 = vpop.f32.mrb[2].mxu1 }
 0x249   : > { %739 = vst [vmem:[#allocation2 + $0x18] sm:$0xff] %v2734_v54  ;;  %747 = vst [vmem:[#allocation2 + $0x58] sm:$0xff] %v2742_v55  ;;  %v676_v56 = vpop.f32.mrb[3].mxu0  ;;  %v708_v57 = vpop.f32.mrb[3].mxu1 }
 0x24a   : > { %737 = vst [vmem:[#allocation2 + $0x8] sm:$0xff] %v676_v56  ;;  %745 = vst [vmem:[#allocation2 + $0x48] sm:$0xff] %v708_v57 }
 0x24e   : > { %v2737_v58 = vpop.f32.mrb[4].mxu0  ;;  %v2745_v59 = vpop.f32.mrb[4].mxu1 }
 0x24f   : > { %742 = vst [vmem:[#allocation2 + $0x30] sm:$0xff] %v2737_v58  ;;  %750 = vst [vmem:[#allocation2 + $0x70] sm:$0xff] %v2745_v59  ;;  %v689_v60 = vpop.f32.mrb[5].mxu0  ;;  %v721_v61 = vpop.f32.mrb[5].mxu1 }
 0x250   : > { %740 = vst [vmem:[#allocation2 + $0x20] sm:$0xff] %v689_v60  ;;  %748 = vst [vmem:[#allocation2 + $0x60] sm:$0xff] %v721_v61  ;;  %v2738_v62 = vpop.f32.mrb[6].mxu0  ;;  %v2746_v63 = vpop.f32.mrb[6].mxu1 }
 0x251   : > { %743 = vst [vmem:[#allocation2 + $0x38] sm:$0xff] %v2738_v62  ;;  %751 = vst [vmem:[#allocation2 + $0x78] sm:$0xff] %v2746_v63  ;;  %v692_v0 = vpop.f32.mrb[7].mxu0  ;;  %v724_v1 = vpop.f32.mrb[7].mxu1 }
 0x252   : > { %741 = vst [vmem:[#allocation2 + $0x28] sm:$0xff] %v692_v0  ;;  %749 = vst [vmem:[#allocation2 + $0x68] sm:$0xff] %v724_v1 }
 0x253 PF: > { %v776_v2 = vld [vmem:[#allocation11] sm:$0xff]  ;;  %v777_v3 = vld [vmem:[#allocation11 + $0x8] sm:$0xff]  ;;  %v778_v4 = vld [vmem:[#allocation11 + $0x10] sm:$0xff]  ;;  %s4799_s20 = sld [smem:[#allocation41_spill]]  ;;  %s4800_s0 = sld [smem:[#allocation43_spill]]  ;;  %vm1771_vm1 = vcmask 7168  }
 0x254   : > { %v792_v5 = vpack.c.bf16 %v777_v3, %v776_v2  ;;  %v779_v6 = vld [vmem:[#allocation11 + $0x18] sm:$0xff]  ;;  %v780_v8 = vld [vmem:[#allocation11 + $0x20] sm:$0xff]  ;;  %v781_v9 = vld [vmem:[#allocation11 + $0x28] sm:$0xff]  ;;  %s4801_s9 = sld [smem:[#allocation31_spill]] }
 0x255   : > { %v793_v7 = vpack.c.bf16 %v779_v6, %v778_v4  ;;  %v794_v10 = vpack.c.bf16 %v781_v9, %v780_v8  ;;  %v752_v11 = vld [vmem:[%s4181_s8] sm:$0xff]  ;;  %v753_v12 = vld [vmem:[%s4181_s8 + $0x8] sm:$0xff]  ;;  %v782_v13 = vld [vmem:[#allocation11 + $0x30] sm:$0xff] }
 0x256   : > { %2747 = vmatprep.subr.bf16.mxu0 %v792_v5  ;;  %v783_v14 = vld [vmem:[#allocation11 + $0x38] sm:$0xff]  ;;  %v768_v15 = vpack.c.bf16 %v753_v12, %v752_v11  ;;  %v784_v17 = vld [vmem:[#allocation11 + $0x40] sm:$0xff]  ;;  %v785_v18 = vld [vmem:[#allocation11 + $0x48] sm:$0xff] }
 0x257   : > { %2748 = vmatpush3.bf16.msra.mxu0 %v792_v5  ;;  %v795_v16 = vpack.c.bf16 %v783_v14, %v782_v13  ;;  %v928_v19 = vld [vmem:[#allocation12] sm:$0xff]  ;;  %v929_v20 = vld [vmem:[#allocation12 + $0x8] sm:$0xff]  ;;  %v930_v21 = vld [vmem:[#allocation12 + $0x10] sm:$0xff]  ;;  %v796_v25 = vpack.c.bf16 %v785_v18, %v784_v17 }
 0x258   : > { %2749 = vmatprep.subr.bf16.mxu0 %v793_v7  ;;  %2763 = vmatprep.mubr.bf16.mxu0 %v768_v15  ;;  %v931_v22 = vld [vmem:[#allocation12 + $0x18] sm:$0xff]  ;;  %v944_v23 = vpack.c.bf16 %v929_v20, %v928_v19  ;;  %v932_v26 = vld [vmem:[#allocation12 + $0x20] sm:$0xff]  ;;  %v933_v27 = vld [vmem:[#allocation12 + $0x28] sm:$0xff] }
 0x259   : > { %v945_v24 = vpack.c.bf16 %v931_v22, %v930_v21  ;;  %v786_v28 = vld [vmem:[#allocation11 + $0x50] sm:$0xff]  ;;  %v787_v29 = vld [vmem:[#allocation11 + $0x58] sm:$0xff]  ;;  %v946_v30 = vpack.c.bf16 %v933_v27, %v932_v26  ;;  %v788_v34 = vld [vmem:[#allocation11 + $0x60] sm:$0xff] }
 0x25a   : > { %2779 = vmatprep.subr.bf16.mxu1 %v944_v23  ;;  %v797_v31 = vpack.c.bf16 %v787_v29, %v786_v28  ;;  %v934_v32 = vld [vmem:[#allocation12 + $0x30] sm:$0xff]  ;;  %v935_v33 = vld [vmem:[#allocation12 + $0x38] sm:$0xff]  ;;  %v789_v35 = vld [vmem:[#allocation11 + $0x68] sm:$0xff]  ;;  %p2580_p5 = scmp.ne.s32.totalorder %s4801_s9, 1 }
 0x25b   : > { %2750 = vmatpush3.bf16.msra.mxu0 %v793_v7  ;;  %2780 = vmatpush3.bf16.msra.mxu1 %v944_v23  ;;  %v947_v36 = vpack.c.bf16 %v935_v33, %v934_v32  ;;  %v798_v37 = vpack.c.bf16 %v789_v35, %v788_v34  ;;  %v936_v38 = vld [vmem:[#allocation12 + $0x40] sm:$0xff]  ;;  %v937_v39 = vld [vmem:[#allocation12 + $0x48] sm:$0xff]  ;;  %v790_v40 = vld [vmem:[#allocation11 + $0x70] sm:$0xff] }
 0x25c   : > { %2751 = vmatprep.subr.bf16.mxu0 %v794_v10  ;;  %2781 = vmatprep.subr.bf16.mxu1 %v945_v24  ;;  %v791_v41 = vld [vmem:[#allocation11 + $0x78] sm:$0xff]  ;;  %v948_v42 = vpack.c.bf16 %v937_v39, %v936_v38  ;;  %v938_v44 = vld [vmem:[#allocation12 + $0x50] sm:$0xff]  ;;  %v756_v49 = vld [vmem:[%s4181_s8 + $0x20] sm:$0xff] }
 0x25d   : > { %v799_v43 = vpack.c.bf16 %v791_v41, %v790_v40  ;;  %v939_v45 = vld [vmem:[#allocation12 + $0x58] sm:$0xff]  ;;  %v754_v46 = vld [vmem:[%s4181_s8 + $0x10] sm:$0xff]  ;;  %v757_v50 = vld [vmem:[%s4181_s8 + $0x28] sm:$0xff] }
 0x25e   : > { %v755_v47 = vld [vmem:[%s4181_s8 + $0x18] sm:$0xff]  ;;  %v949_v48 = vpack.c.bf16 %v939_v45, %v938_v44  ;;  %v770_v52 = vpack.c.bf16 %v757_v50, %v756_v49  ;;  %v758_v53 = vld [vmem:[%s4181_s8 + $0x30] sm:$0xff]  ;;  %v760_v55 = vld [vmem:[%s4181_s8 + $0x40] sm:$0xff] }
 0x25f   : > { %2752 = vmatpush3.bf16.msra.mxu0 %v794_v10  ;;  %2782 = vmatpush3.bf16.msra.mxu1 %v945_v24  ;;  %v769_v51 = vpack.c.bf16 %v755_v47, %v754_v46  ;;  %v759_v54 = vld [vmem:[%s4181_s8 + $0x38] sm:$0xff]  ;;  %v761_v56 = vld [vmem:[%s4181_s8 + $0x48] sm:$0xff]  ;;  %v762_v59 = vld [vmem:[%s4181_s8 + $0x50] sm:$0xff] }
 0x260   : > { %2753 = vmatprep.subr.bf16.mxu0 %v795_v16  ;;  %2783 = vmatprep.subr.bf16.mxu1 %v946_v30  ;;  %v771_v57 = vpack.c.bf16 %v759_v54, %v758_v53  ;;  %v772_v58 = vpack.c.bf16 %v761_v56, %v760_v55  ;;  %v763_v60 = vld [vmem:[%s4181_s8 + $0x58] sm:$0xff]  ;;  %v764_v61 = vld [vmem:[%s4181_s8 + $0x60] sm:$0xff]  ;;  %v765_v62 = vld [vmem:[%s4181_s8 + $0x68] sm:$0xff] }
 0x261   : > { %v773_v63 = vpack.c.bf16 %v763_v60, %v762_v59  ;;  %v774_v0 = vpack.c.bf16 %v765_v62, %v764_v61  ;;  %v766_v1 = vld [vmem:[%s4181_s8 + $0x70] sm:$0xff]  ;;  %v767_v2 = vld [vmem:[%s4181_s8 + $0x78] sm:$0xff]  ;;  %v940_v4 = vld [vmem:[#allocation12 + $0x60] sm:$0xff] }
 0x262   : > { %v775_v3 = vpack.c.bf16 %v767_v2, %v766_v1  ;;  %v941_v5 = vld [vmem:[#allocation12 + $0x68] sm:$0xff]  ;;  %v942_v7 = vld [vmem:[#allocation12 + $0x70] sm:$0xff]  ;;  %v943_v8 = vld [vmem:[#allocation12 + $0x78] sm:$0xff] }
 0x263   : > { %2754 = vmatpush3.bf16.msra.mxu0 %v795_v16  ;;  %2784 = vmatpush3.bf16.msra.mxu1 %v946_v30  ;;  %v950_v6 = vpack.c.bf16 %v941_v5, %v940_v4  ;;  %v951_v9 = vpack.c.bf16 %v943_v8, %v942_v7  ;;  %v1064_v10 = vld [vmem:[#allocation15] sm:$0xff]  ;;  %v1065_v11 = vld [vmem:[#allocation15 + $0x8] sm:$0xff]  ;;  %v1066_v15 = vld [vmem:[#allocation15 + $0x10] sm:$0xff] }
 0x264   : > { %2755 = vmatprep.subr.bf16.mxu0 %v796_v25  ;;  %2785 = vmatprep.subr.bf16.mxu1 %v947_v36  ;;  %v1185_v12 = vld [vmem:[#allocation17] sm:$0xff]  ;;  %v1080_v13 = vpack.c.bf16 %v1065_v11, %v1064_v10  ;;  %v1186_v14 = vld [vmem:[#allocation17 + $0x8] sm:$0xff]  ;;  %v1067_v16 = vld [vmem:[#allocation15 + $0x18] sm:$0xff] }
 0x265   : > { %v1201_v17 = vpack.c.bf16 %v1186_v14, %v1185_v12  ;;  %v1081_v18 = vpack.c.bf16 %v1067_v16, %v1066_v15  ;;  %v1068_v19 = vld [vmem:[#allocation15 + $0x20] sm:$0xff]  ;;  %v1069_v20 = vld [vmem:[#allocation15 + $0x28] sm:$0xff]  ;;  %v1070_v22 = vld [vmem:[#allocation15 + $0x30] sm:$0xff] }
 0x266   : > { %v1082_v21 = vpack.c.bf16 %v1069_v20, %v1068_v19  ;;  %v1071_v23 = vld [vmem:[#allocation15 + $0x38] sm:$0xff]  ;;  %v1073_v26 = vld [vmem:[#allocation15 + $0x48] sm:$0xff]  ;;  %v1074_v28 = vld [vmem:[#allocation15 + $0x50] sm:$0xff] }
 0x267   : > { %2756 = vmatpush3.bf16.msra.mxu0 %v796_v25  ;;  %2786 = vmatpush3.bf16.msra.mxu1 %v947_v36  ;;  %v1083_v24 = vpack.c.bf16 %v1071_v23, %v1070_v22  ;;  %v1072_v25 = vld [vmem:[#allocation15 + $0x40] sm:$0xff]  ;;  %v1075_v29 = vld [vmem:[#allocation15 + $0x58] sm:$0xff]  ;;  %v1187_v44 = vld [vmem:[#allocation17 + $0x10] sm:$0xff] }
 0x268   : > { %2757 = vmatprep.subr.bf16.mxu0 %v797_v31  ;;  %2787 = vmatprep.subr.bf16.mxu1 %v948_v42  ;;  %v1084_v27 = vpack.c.bf16 %v1073_v26, %v1072_v25  ;;  %v1085_v30 = vpack.c.bf16 %v1075_v29, %v1074_v28  ;;  %v1188_v45 = vld [vmem:[#allocation17 + $0x18] sm:$0xff]  ;;  %v1189_v54 = vld [vmem:[#allocation17 + $0x20] sm:$0xff]  ;;  %v1190_v55 = vld [vmem:[#allocation17 + $0x28] sm:$0xff] }
 0x269   : > { %v1203_v62 = vpack.c.bf16 %v1190_v55, %v1189_v54  ;;  %v1192_v1 = vld [vmem:[#allocation17 + $0x38] sm:$0xff]  ;;  %v1193_v10 = vld [vmem:[#allocation17 + $0x40] sm:$0xff]  ;;  %v1194_v11 = vld [vmem:[#allocation17 + $0x48] sm:$0xff] }
 0x26a   : > { %v1195_v20 = vld [vmem:[#allocation17 + $0x50] sm:$0xff] }
 0x26b   : > { %2758 = vmatpush3.bf16.msra.mxu0 %v797_v31  ;;  %2788 = vmatpush3.bf16.msra.mxu1 %v948_v42  ;;  %v4273_v31 = vld [vmem:[%s4799_s20] ss:$0 sm:$0xff] }
 0x26c   : > { %2759 = vmatprep.subr.bf16.mxu0 %v798_v37  ;;  %2789 = vmatprep.subr.bf16.mxu1 %v949_v48 }
 0x26f   : > { %2760 = vmatpush3.bf16.msra.mxu0 %v798_v37  ;;  %2790 = vmatpush3.bf16.msra.mxu1 %v949_v48 }
 0x270   : > { %2761 = vmatprep.subr.bf16.mxu0 %v799_v43  ;;  %2791 = vmatprep.subr.bf16.mxu1 %v950_v6 }
 0x273   : > { %2762 = vmatpush3.bf16.msra.mxu0 %v799_v43  ;;  %2792 = vmatpush3.bf16.msra.mxu1 %v950_v6 }
 0x274   : > { %2793 = vmatprep.subr.bf16.mxu1 %v951_v9  ;;  %2811 = vmatprep.subr.bf16.mxu0 %v1080_v13 }
 0x276   : > { %2764 = vmatmul.mubr.bf16.vlgmr.msra.gmra.mrb[0].mxu0 %v769_v51  ;;  %v1202_v51 = vpack.c.bf16 %v1188_v45, %v1187_v44  ;;  %v1198_v44 = vld [vmem:[#allocation17 + $0x68] sm:$0xff] }
 0x277   : > { %2767 = vmatprep.mubr.bf16.mxu0 %v770_v52  ;;  %2794 = vmatpush3.bf16.msra.mxu1 %v951_v9 }
 0x278   : > { %2812 = vmatpush3.bf16.msra.mxu0 %v1080_v13  ;;  %2843 = vmatprep.subr.bf16.mxu1 %v1201_v17 }
 0x279   : > { %2813 = vmatprep.subr.bf16.mxu0 %v1081_v18 }
 0x27c   : > { %2814 = vmatpush3.bf16.msra.mxu0 %v1081_v18  ;;  %v1205_v18 = vpack.c.bf16 %v1194_v11, %v1193_v10 }
 0x27d   : > { %2815 = vmatprep.subr.bf16.mxu0 %v1082_v21 }
 0x27e   : > { %2768 = vmatmul.mubr.bf16.gmra.mrb[4].mxu0 %v771_v57 }
 0x27f   : > { %2771 = vmatprep.mubr.bf16.mxu0 %v772_v58 }
 0x280   : > { %2816 = vmatpush3.bf16.msra.mxu0 %v1082_v21  ;;  %v1196_v21 = vld [vmem:[#allocation17 + $0x58] sm:$0xff] }
 0x281   : > { %2817 = vmatprep.subr.bf16.mxu0 %v1083_v24 }
 0x284   : > { %2818 = vmatpush3.bf16.msra.mxu0 %v1083_v24 }
 0x285   : > { %2819 = vmatprep.subr.bf16.mxu0 %v1084_v27 }
 0x286   : > { %2772 = vmatmul.mubr.bf16.gmra.mrb[8].mxu0 %v773_v63 }
 0x287   : > { %2775 = vmatprep.mubr.bf16.mxu0 %v774_v0  ;;  %v1191_v0 = vld [vmem:[#allocation17 + $0x30] sm:$0xff] }
 0x288   : > { %2820 = vmatpush3.bf16.msra.mxu0 %v1084_v27  ;;  %v1204_v7 = vpack.c.bf16 %v1192_v1, %v1191_v0  ;;  %v1206_v27 = vpack.c.bf16 %v1196_v21, %v1195_v20 }
 0x289   : > { %2821 = vmatprep.subr.bf16.mxu0 %v1085_v30 }
 0x28c   : > { %2822 = vmatpush3.bf16.msra.mxu0 %v1085_v30 }
 0x28e   : > { %2776 = vmatmul.mubr.bf16.gmra.mrb[12].mxu0 %v775_v3 }
 0x349   : > { %v2765_v32 = vpop.f32.mrb[0].mxu0 }
 0x34a   : > { %v850_v33 = vadd.f32 %v2765_v32, %v4273_v31  ;;  %v841_v34 = vpop.f32.mrb[1].mxu0 }
 0x34b   : > { %v842_v35 = vadd.f32 %v4273_v31, %v841_v34  ;;  %v2766_v36 = vpop.f32.mrb[2].mxu0 }
 0x34c   : > { %v853_v37 = vadd.f32 %v2766_v36, %v4273_v31  ;;  %v844_v38 = vpop.f32.mrb[3].mxu0  ;;  %v906_v40 = vmax.f32 %v850_v33, 0.0 }
 0x34d   : > { %v845_v39 = vadd.f32 %v4273_v31, %v844_v38  ;;  %v904_v42 = vmax.f32 %v842_v35, 0.0 }
 0x34e   : > { %v907_v41 = vmax.f32 %v853_v37, 0.0 }
 0x34f   : > { %v905_v43 = vmax.f32 %v845_v39, 0.0 }
 0x350   : > { %v921_v46 = vpack.c.bf16 %v907_v41, %v906_v40  ;;  %v1076_v40 = vld [vmem:[#allocation15 + $0x60] sm:$0xff]  ;;  %v1077_v41 = vld [vmem:[#allocation15 + $0x68] sm:$0xff] }
 0x351   : > { %v2769_v47 = vpop.f32.mrb[4].mxu0  ;;  %v920_v48 = vpack.c.bf16 %v905_v43, %v904_v42  ;;  %v1197_v42 = vld [vmem:[#allocation17 + $0x60] sm:$0xff]  ;;  %v1086_v43 = vpack.c.bf16 %v1077_v41, %v1076_v40 }
 0x352   : > { %v866_v49 = vadd.f32 %v2769_v47, %v4273_v31  ;;  %v857_v50 = vpop.f32.mrb[5].mxu0  ;;  %v1207_v45 = vpack.c.bf16 %v1198_v44, %v1197_v42  ;;  %v1199_v47 = vld [vmem:[#allocation17 + $0x70] sm:$0xff] }
 0x353   : > { %v858_v52 = vadd.f32 %v4273_v31, %v857_v50  ;;  %v2770_v53 = vpop.f32.mrb[6].mxu0  ;;  %2795 = vmatprep.mubr.bf16.mxu1 %v920_v48  ;;  %2823 = vmatprep.subr.bf16.mxu0 %v1086_v43 }
 0x354   : > { %v910_v56 = vmax.f32 %v866_v49, 0.0  ;;  %v869_v57 = vadd.f32 %v2770_v53, %v4273_v31  ;;  %v860_v58 = vpop.f32.mrb[7].mxu0  ;;  %2796 = vmatmul.mubr.bf16.vlgmr.msra.gmra.mrb[0].mxu1 %v921_v46  ;;  %2824 = vmatpush3.bf16.msra.mxu0 %v1086_v43  ;;  %v1078_v46 = vld [vmem:[#allocation15 + $0x70] sm:$0xff]  ;;  %v1200_v49 = vld [vmem:[#allocation17 + $0x78] sm:$0xff] }
 0x355   : > { %v908_v59 = vmax.f32 %v858_v52, 0.0  ;;  %v861_v60 = vadd.f32 %v4273_v31, %v860_v58  ;;  %2844 = vmatpush3.bf16.msra.mxu1 %v1201_v17  ;;  %v1208_v50 = vpack.c.bf16 %v1200_v49, %v1199_v47  ;;  %v2579_v52 = vld [vmem:[%s4800_s0] ss:$0 sm:$0xff] }
 0x356   : > { %v911_v61 = vmax.f32 %v869_v57, 0.0  ;;  %2845 = vmatprep.subr.bf16.mxu1 %v1202_v51 }
 0x357   : > { %v909_v63 = vmax.f32 %v861_v60, 0.0 }
 0x358   : > { %v923_v2 = vpack.c.bf16 %v911_v61, %v910_v56 }
 0x359   : > { %v922_v3 = vpack.c.bf16 %v909_v63, %v908_v59  ;;  %v2773_v4 = vpop.f32.mrb[8].mxu0  ;;  %2846 = vmatpush3.bf16.msra.mxu1 %v1202_v51 }
 0x35a   : > { %v882_v5 = vadd.f32 %v2773_v4, %v4273_v31  ;;  %v873_v6 = vpop.f32.mrb[9].mxu0  ;;  %2847 = vmatprep.subr.bf16.mxu1 %v1203_v62 }
 0x35b   : > { %v874_v8 = vadd.f32 %v4273_v31, %v873_v6  ;;  %v2774_v9 = vpop.f32.mrb[10].mxu0  ;;  %2799 = vmatprep.mubr.bf16.mxu1 %v922_v3 }
 0x35c   : > { %v914_v12 = vmax.f32 %v882_v5, 0.0  ;;  %v885_v13 = vadd.f32 %v2774_v9, %v4273_v31  ;;  %v876_v14 = vpop.f32.mrb[11].mxu0  ;;  %2800 = vmatmul.mubr.bf16.gmra.mrb[4].mxu1 %v923_v2 }
 0x35d   : > { %v912_v15 = vmax.f32 %v874_v8, 0.0  ;;  %v877_v16 = vadd.f32 %v4273_v31, %v876_v14  ;;  %2848 = vmatpush3.bf16.msra.mxu1 %v1203_v62 }
 0x35e   : > { %v915_v17 = vmax.f32 %v885_v13, 0.0  ;;  %2849 = vmatprep.subr.bf16.mxu1 %v1204_v7 }
 0x35f   : > { %v913_v19 = vmax.f32 %v877_v16, 0.0 }
 0x360   : > { %v925_v22 = vpack.c.bf16 %v915_v17, %v914_v12 }
 0x361   : > { %v924_v23 = vpack.c.bf16 %v913_v19, %v912_v15  ;;  %v2777_v24 = vpop.f32.mrb[12].mxu0  ;;  %2850 = vmatpush3.bf16.msra.mxu1 %v1204_v7 }
 0x362   : > { %v898_v25 = vadd.f32 %v2777_v24, %v4273_v31  ;;  %v889_v26 = vpop.f32.mrb[13].mxu0  ;;  %2851 = vmatprep.subr.bf16.mxu1 %v1205_v18 }
 0x363   : > { %2803 = vmatprep.mubr.bf16.mxu1 %v924_v23  ;;  %v890_v28 = vadd.f32 %v4273_v31, %v889_v26  ;;  %v2778_v29 = vpop.f32.mrb[14].mxu0 }
 0x364   : > { %2804 = vmatmul.mubr.bf16.gmra.mrb[8].mxu1 %v925_v22  ;;  %v918_v30 = vmax.f32 %v898_v25, 0.0  ;;  %v901_v32 = vadd.f32 %v2778_v29, %v4273_v31  ;;  %v892_v33 = vpop.f32.mrb[15].mxu0  ;;  %v1307_v29 = vld [vmem:[#allocation2 + $0x8] sm:$0xff] }
 0x365   : > { %v916_v34 = vmax.f32 %v890_v28, 0.0  ;;  %v893_v35 = vadd.f32 %v4273_v31, %v892_v33  ;;  %2852 = vmatpush3.bf16.msra.mxu1 %v1205_v18  ;;  %v1079_v31 = vld [vmem:[#allocation15 + $0x78] sm:$0xff]  ;;  %v1306_v28 = vld [vmem:[#allocation2] sm:$0xff] }
 0x366   : > { %v919_v36 = vmax.f32 %v901_v32, 0.0  ;;  %2853 = vmatprep.subr.bf16.mxu1 %v1206_v27  ;;  %v1087_v48 = vpack.c.bf16 %v1079_v31, %v1078_v46 }
 0x367   : > { %v917_v37 = vmax.f32 %v893_v35, 0.0 }
 0x368   : > { %v927_v38 = vpack.c.bf16 %v919_v36, %v918_v30  ;;  %2825 = vmatprep.subr.bf16.mxu0 %v1087_v48  ;;  %v1322_v30 = vpack.c.bf16 %v1307_v29, %v1306_v28  ;;  %v1317_v28 = vld [vmem:[#allocation2 + $0x58] sm:$0xff]  ;;  %v1318_v29 = vld [vmem:[#allocation2 + $0x60] sm:$0xff] }
 0x369   : > { %v926_v39 = vpack.c.bf16 %v917_v37, %v916_v34  ;;  %2854 = vmatpush3.bf16.msra.mxu1 %v1206_v27  ;;  %2826 = vmatpush3.bf16.msra.mxu0 %v1087_v48 }
 0x36a   : > { %2855 = vmatprep.subr.bf16.mxu1 %v1207_v45 }
 0x36b   : > { %2807 = vmatprep.mubr.bf16.mxu1 %v926_v39 }
 0x36c   : > { %2808 = vmatmul.mubr.bf16.gmra.mrb[12].mxu1 %v927_v38 }
 0x36d   : > { %2856 = vmatpush3.bf16.msra.mxu1 %v1207_v45 }
 0x36e   : > { %2857 = vmatprep.subr.bf16.mxu1 %v1208_v50 }
 0x371   : > { %2858 = vmatpush3.bf16.msra.mxu1 %v1208_v50 }
 0x427   : > { %v2797_v51 = vpop.f32.mrb[0].mxu1 }
 0x428   : > { %v993_v53 = vpop.f32.mrb[1].mxu1  ;;  %v1002_v55 = vadd.f32 %v2797_v51, %v2579_v52 }
 0x429   : > { %v2798_v54 = vpop.f32.mrb[2].mxu1  ;;  %v994_v58 = vadd.f32 %v2579_v52, %v993_v53 }
 0x42a   : > { %v1005_v56 = vadd.f32 %v2798_v54, %v2579_v52  ;;  %v996_v57 = vpop.f32.mrb[3].mxu1 }
 0x42b   : > { %v997_v59 = vadd.f32 %v2579_v52, %v996_v57 }
 0x42c   : > { %v1057_v60 = vpack.c.bf16 %v1005_v56, %v1002_v55 }
 0x42d   : > { %v1056_v61 = vpack.c.bf16 %v997_v59, %v994_v58 }
 0x42f   : > { %v2801_v62 = vpop.f32.mrb[4].mxu1  ;;  %2827 = vmatprep.mubr.bf16.mxu0 %v1056_v61  ;;  %2859 = vmatprep.mubr.bf16.mxu1 %v1056_v61 }
 0x430   : > { %v1018_v63 = vadd.f32 %v2801_v62, %v2579_v52  ;;  %v1009_v0 = vpop.f32.mrb[5].mxu1  ;;  %2828 = vmatmul.mubr.bf16.vlgmr.msra.gmra.mrb[16].mxu0 %v1057_v60  ;;  %2860 = vmatmul.mubr.bf16.vlgmr.msra.gmra.mrb[16].mxu1 %v1057_v60 }
 0x431   : > { %v1010_v1 = vadd.f32 %v2579_v52, %v1009_v0  ;;  %v2802_v2 = vpop.f32.mrb[6].mxu1 }
 0x432   : > { %v1021_v3 = vadd.f32 %v2802_v2, %v2579_v52  ;;  %v1012_v4 = vpop.f32.mrb[7].mxu1 }
 0x433   : > { %v1013_v5 = vadd.f32 %v2579_v52, %v1012_v4 }
 0x434   : > { %v1059_v6 = vpack.c.bf16 %v1021_v3, %v1018_v63 }
 0x435   : > { %v1058_v7 = vpack.c.bf16 %v1013_v5, %v1010_v1 }
 0x437   : > { %v2805_v8 = vpop.f32.mrb[8].mxu1  ;;  %2831 = vmatprep.mubr.bf16.mxu0 %v1058_v7  ;;  %2863 = vmatprep.mubr.bf16.mxu1 %v1058_v7 }
 0x438   : > { %v1034_v9 = vadd.f32 %v2805_v8, %v2579_v52  ;;  %v1025_v10 = vpop.f32.mrb[9].mxu1  ;;  %2832 = vmatmul.mubr.bf16.gmra.mrb[20].mxu0 %v1059_v6  ;;  %2864 = vmatmul.mubr.bf16.gmra.mrb[20].mxu1 %v1059_v6 }
 0x439   : > { %v1026_v11 = vadd.f32 %v2579_v52, %v1025_v10  ;;  %v2806_v12 = vpop.f32.mrb[10].mxu1 }
 0x43a   : > { %v1037_v13 = vadd.f32 %v2806_v12, %v2579_v52  ;;  %v1028_v14 = vpop.f32.mrb[11].mxu1 }
 0x43b   : > { %v1029_v15 = vadd.f32 %v2579_v52, %v1028_v14 }
 0x43c   : > { %v1061_v16 = vpack.c.bf16 %v1037_v13, %v1034_v9 }
 0x43d   : > { %v1060_v17 = vpack.c.bf16 %v1029_v15, %v1026_v11  ;;  %v1308_v15 = vld [vmem:[#allocation2 + $0x10] sm:$0xff] }
 0x43f   : > { %2867 = vmatprep.mubr.bf16.mxu1 %v1060_v17  ;;  %2835 = vmatprep.mubr.bf16.mxu0 %v1060_v17  ;;  %v2809_v18 = vpop.f32.mrb[12].mxu1  ;;  %v1310_v17 = vld [vmem:[#allocation2 + $0x20] sm:$0xff] }
 0x440   : > { %2868 = vmatmul.mubr.bf16.gmra.mrb[24].mxu1 %v1061_v16  ;;  %2836 = vmatmul.mubr.bf16.gmra.mrb[24].mxu0 %v1061_v16  ;;  %v1050_v19 = vadd.f32 %v2809_v18, %v2579_v52  ;;  %v1041_v20 = vpop.f32.mrb[13].mxu1  ;;  %v1309_v16 = vld [vmem:[#allocation2 + $0x18] sm:$0xff]  ;;  %v1311_v18 = vld [vmem:[#allocation2 + $0x28] sm:$0xff] }
 0x441   : > { %v1042_v21 = vadd.f32 %v2579_v52, %v1041_v20  ;;  %v2810_v22 = vpop.f32.mrb[14].mxu1  ;;  %v1324_v20 = vpack.c.bf16 %v1311_v18, %v1310_v17  ;;  %v4360_v17 = vld [vmem:[#allocation3 + $0x20] sm:$0xff]  ;;  %v4364_v18 = vld [vmem:[#allocation3 + $0x38] sm:$0xff] }
 0x442   : > { %v1053_v23 = vadd.f32 %v2810_v22, %v2579_v52  ;;  %v1044_v24 = vpop.f32.mrb[15].mxu1  ;;  %v1313_v22 = vld [vmem:[#allocation2 + $0x38] sm:$0xff] }
 0x443   : > { %v1045_v25 = vadd.f32 %v2579_v52, %v1044_v24  ;;  %v1315_v24 = vld [vmem:[#allocation2 + $0x48] sm:$0xff] }
 0x444   : > { %v1063_v26 = vpack.c.bf16 %v1053_v23, %v1050_v19  ;;  %v1323_v19 = vpack.c.bf16 %v1309_v16, %v1308_v15  ;;  %v1314_v23 = vld [vmem:[#allocation2 + $0x40] sm:$0xff] }
 0x445   : > { %v1062_v27 = vpack.c.bf16 %v1045_v25, %v1042_v21  ;;  %v1312_v21 = vld [vmem:[#allocation2 + $0x30] sm:$0xff] }
 0x446   : > { %v1325_v25 = vpack.c.bf16 %v1313_v22, %v1312_v21 }
 0x447   : > { %2871 = vmatprep.mubr.bf16.mxu1 %v1062_v27  ;;  %2839 = vmatprep.mubr.bf16.mxu0 %v1062_v27  ;;  %v1316_v27 = vld [vmem:[#allocation2 + $0x50] sm:$0xff] }
 0x448   : > { %2872 = vmatmul.mubr.bf16.gmra.mrb[28].mxu1 %v1063_v26  ;;  %2840 = vmatmul.mubr.bf16.gmra.mrb[28].mxu0 %v1063_v26  ;;  %v1326_v26 = vpack.c.bf16 %v1315_v24, %v1314_v23  ;;  %v4373_v23 = vld [vmem:[#allocation3 + $0x30] sm:$0xff]  ;;  %v1456_v24 = vld [vmem:[#allocation3 + $0x28] sm:$0xff] }
 0x449   : > { %2891 = vmatprep.mubr.bf16.mxu0 %v1322_v30  ;;  %v1319_v30 = vld [vmem:[#allocation2 + $0x68] sm:$0xff] }
 0x503   : > { %v2829_v32 = vpop.f32.mrb[16].mxu0  ;;  %v2861_v33 = vpop.f32.mrb[16].mxu1 }
 0x504   : > { %v1122_v34 = vpop.f32.mrb[17].mxu0  ;;  %v1243_v35 = vpop.f32.mrb[17].mxu1 }
 0x505   : > { %v2830_v36 = vpop.f32.mrb[18].mxu0  ;;  %v2862_v37 = vpop.f32.mrb[18].mxu1 }
 0x506   : > { %v1331_v38 = vpack.c.bf16 %v2830_v36, %v2829_v32  ;;  %v1909_v39 = vpack.c.bf16 %v2862_v37, %v2861_v33  ;;  %v1125_v40 = vpop.f32.mrb[19].mxu0  ;;  %v1246_v41 = vpop.f32.mrb[19].mxu1  ;;  %v1327_v32 = vpack.c.bf16 %v1317_v28, %v1316_v27  ;;  %v1328_v33 = vpack.c.bf16 %v1319_v30, %v1318_v29  ;;  %v4382_v29 = vld [vmem:[#allocation3 + $0x40] sm:$0xff]  ;;  %v4387_v30 = vld [vmem:[#allocation3 + $0x58] sm:$0xff] }
 0x507   : > { %v1330_v42 = vpack.c.bf16 %v1125_v40, %v1122_v34  ;;  %v1908_v43 = vpack.c.bf16 %v1246_v41, %v1243_v35  ;;  %v1320_v34 = vld [vmem:[#allocation2 + $0x70] sm:$0xff]  ;;  %v1321_v35 = vld [vmem:[#allocation2 + $0x78] sm:$0xff] }
 0x508   : > { %v1329_v36 = vpack.c.bf16 %v1321_v35, %v1320_v34 }
 0x509   : > { %2875 = vmatprep.subr.bf16.mxu0 %v1330_v42  ;;  %2907 = vmatprep.subr.bf16.mxu1 %v1908_v43 }
 0x50a   : > { %2876 = vmatpush3.bf16.xpose.msra.mxu0 %v1330_v42  ;;  %2908 = vmatpush3.bf16.msra.mxu1 %v1908_v43 }
 0x50b   : > { %v2833_v44 = vpop.f32.mrb[20].mxu0  ;;  %v2865_v45 = vpop.f32.mrb[20].mxu1  ;;  %2877 = vmatprep.subr.bf16.mxu0 %v1331_v38  ;;  %2909 = vmatprep.subr.bf16.mxu1 %v1909_v39 }
 0x50c   : > { %v1138_v46 = vpop.f32.mrb[21].mxu0  ;;  %v1259_v31 = vpop.f32.mrb[21].mxu1 }
 0x50d   : > { %v2834_v47 = vpop.f32.mrb[22].mxu0  ;;  %v2866_v48 = vpop.f32.mrb[22].mxu1 }
 0x50e   : > { %v1333_v49 = vpack.c.bf16 %v2834_v47, %v2833_v44  ;;  %v1911_v50 = vpack.c.bf16 %v2866_v48, %v2865_v45  ;;  %v1141_v51 = vpop.f32.mrb[23].mxu0  ;;  %v1262_v52 = vpop.f32.mrb[23].mxu1  ;;  %2910 = vmatpush3.bf16.msra.mxu1 %v1909_v39 }
 0x50f   : > { %v1332_v53 = vpack.c.bf16 %v1141_v51, %v1138_v46  ;;  %v1910_v54 = vpack.c.bf16 %v1262_v52, %v1259_v31 }
 0x511   : > { %2911 = vmatprep.subr.bf16.mxu1 %v1910_v54 }
 0x512   : > { %2878 = vmatpush3.bf16.xpose.msra.mxu0 %v1331_v38  ;;  %2912 = vmatpush3.bf16.msra.mxu1 %v1910_v54 }
 0x513   : > { %v2869_v55 = vpop.f32.mrb[24].mxu1  ;;  %2879 = vmatprep.subr.bf16.mxu0 %v1332_v53  ;;  %2913 = vmatprep.subr.bf16.mxu1 %v1911_v50  ;;  %v2837_v56 = vpop.f32.mrb[24].mxu0 }
 0x514   : > { %v1275_v57 = vpop.f32.mrb[25].mxu1  ;;  %v1154_v58 = vpop.f32.mrb[25].mxu0 }
 0x515   : > { %v2870_v59 = vpop.f32.mrb[26].mxu1  ;;  %v2838_v60 = vpop.f32.mrb[26].mxu0 }
 0x516   : > { %v1913_v61 = vpack.c.bf16 %v2870_v59, %v2869_v55  ;;  %v1278_v62 = vpop.f32.mrb[27].mxu1  ;;  %2914 = vmatpush3.bf16.msra.mxu1 %v1911_v50  ;;  %v1335_v63 = vpack.c.bf16 %v2838_v60, %v2837_v56  ;;  %v1157_v0 = vpop.f32.mrb[27].mxu0  ;;  %v3695_v56 = vmov 0  }
 0x517   : > { %v1912_v1 = vpack.c.bf16 %v1278_v62, %v1275_v57  ;;  %v1334_v2 = vpack.c.bf16 %v1157_v0, %v1154_v58  ;;  %3196 = vset.pattern.permute.xlu1 %v3695_v56  ;;  %3195 = vset.pattern.permute.xlu0 %v3695_v56 }
 0x519   : > { %2915 = vmatprep.subr.bf16.mxu1 %v1912_v1 }
 0x51a   : > { %2880 = vmatpush3.bf16.xpose.msra.mxu0 %v1332_v53  ;;  %2916 = vmatpush3.bf16.msra.mxu1 %v1912_v1 }
 0x51b   : > { %2881 = vmatprep.subr.bf16.mxu0 %v1333_v49  ;;  %2917 = vmatprep.subr.bf16.mxu1 %v1913_v61  ;;  %v2873_v3 = vpop.f32.mrb[28].mxu1  ;;  %v2841_v4 = vpop.f32.mrb[28].mxu0 }
 0x51c   : > { %v1291_v5 = vpop.f32.mrb[29].mxu1  ;;  %v1170_v6 = vpop.f32.mrb[29].mxu0 }
 0x51d   : > { %v2874_v7 = vpop.f32.mrb[30].mxu1  ;;  %v2842_v8 = vpop.f32.mrb[30].mxu0 }
 0x51e   : > { %2918 = vmatpush3.bf16.msra.mxu1 %v1913_v61  ;;  %v1915_v9 = vpack.c.bf16 %v2874_v7, %v2873_v3  ;;  %v1294_v10 = vpop.f32.mrb[31].mxu1  ;;  %v1337_v11 = vpack.c.bf16 %v2842_v8, %v2841_v4  ;;  %v1173_v12 = vpop.f32.mrb[31].mxu0 }
 0x51f   : > { %v1914_v13 = vpack.c.bf16 %v1294_v10, %v1291_v5  ;;  %v1336_v14 = vpack.c.bf16 %v1173_v12, %v1170_v6  ;;  %v4342_v5 = vld [vmem:[#allocation3 + $0x10] sm:$0xff]  ;;  %v1451_v6 = vld [vmem:[#allocation3] sm:$0xff]  ;;  %v4352_v12 = vld [vmem:[#allocation3 + $0x8] sm:$0xff] }
 0x521   : > { %2919 = vmatprep.subr.bf16.mxu1 %v1914_v13 }
 0x522   : > { %2882 = vmatpush3.bf16.xpose.msra.mxu0 %v1333_v49  ;;  %2920 = vmatpush3.bf16.msra.mxu1 %v1914_v13 }
 0x523   : > { %2883 = vmatprep.subr.bf16.mxu0 %v1334_v2  ;;  %2921 = vmatprep.subr.bf16.mxu1 %v1915_v9 }
 0x526   : > { %2922 = vmatpush3.bf16.msra.mxu1 %v1915_v9 }
 0x52a   : > { %2884 = vmatpush3.bf16.xpose.msra.mxu0 %v1334_v2 }
 0x52b   : > { %2885 = vmatprep.subr.bf16.mxu0 %v1335_v63 }
 0x532   : > { %2886 = vmatpush3.bf16.xpose.msra.mxu0 %v1335_v63 }
 0x533   : > { %2887 = vmatprep.subr.bf16.mxu0 %v1336_v14 }
 0x53a   : > { %2888 = vmatpush3.bf16.xpose.msra.mxu0 %v1336_v14 }
 0x53b   : > { %2889 = vmatprep.subr.bf16.mxu0 %v1337_v11 }
 0x542   : > { %2890 = vmatpush3.bf16.xpose.msra.mxu0 %v1337_v11  ;;  %v4347_v11 = vld [vmem:[#allocation3 + $0x18] sm:$0xff] }
 0x549   : > { %2892 = vmatmul.mubr.bf16.vlgmr.msra.gmra.mrb[32].mxu0 %v1323_v19 }
 0x54a   : > { %2895 = vmatprep.mubr.bf16.mxu0 %v1324_v20 }
 0x551   : > { %2896 = vmatmul.mubr.bf16.gmra.mrb[36].mxu0 %v1325_v25 }
 0x552   : > { %2899 = vmatprep.mubr.bf16.mxu0 %v1326_v26 }
 0x559   : > { %2900 = vmatmul.mubr.bf16.gmra.mrb[40].mxu0 %v1327_v32 }
 0x55a   : > { %2903 = vmatprep.mubr.bf16.mxu0 %v1328_v33 }
 0x561   : > { %2904 = vmatmul.mubr.bf16.gmra.mrb[44].mxu0 %v1329_v36  ;;  %v4396_v36 = vld [vmem:[#allocation3 + $0x50] sm:$0xff] }
 0x61c   : > { %v2893_v37 = vpop.f32.mrb[32].mxu0 }
 0x61d   : > { %v4294_v38 = vmul.f32 0.17677669, %v2893_v37  ;;  %v1372_v39 = vpop.f32.mrb[33].mxu0  ;;  %v4401_v37 = vld [vmem:[#allocation3 + $0x48] sm:$0xff] }
 0x61e   : > { %v4296_v40 = vmul.f32 0.17677669, %v1372_v39  ;;  %v2894_v41 = vpop.f32.mrb[34].mxu0 }
 0x61f   : > { %1471 = vmax.xlane.f32.xlu1 %v4294_v38  ;;  %v1375_v42 = vpop.f32.mrb[35].mxu0  ;;  %v4300_v43 = vmul.f32 0.17677669, %v2894_v41 }
 0x620   : > { %1467 = vmax.xlane.f32.xlu0 %v4296_v40  ;;  %v4302_v44 = vmul.f32 0.17677669, %v1375_v42 }
 0x623   : > { %1473 = vmax.xlane.f32.xlu1 %v4300_v43 }
 0x624   : > { %1469 = vmax.xlane.f32.xlu0 %v4302_v44  ;;  %v2897_v45 = vpop.f32.mrb[36].mxu0 }
 0x625   : > { %v1388_v46 = vpop.f32.mrb[37].mxu0  ;;  %v4312_v50 = vmul.f32 0.17677669, %v2897_v45 }
 0x626   : > { %v4306_v31 = vmul.f32 0.17677669, %v1388_v46  ;;  %v2898_v47 = vpop.f32.mrb[38].mxu0 }
 0x627   : > { %v4308_v48 = vmul.f32 0.17677669, %v2898_v47  ;;  %v1391_v49 = vpop.f32.mrb[39].mxu0  ;;  %v4409_v47 = vld [vmem:[#allocation3 + $0x60] sm:$0xff] }
 0x628   : > { %1475 = vmax.xlane.f32.xlu0 %v4306_v31  ;;  %v4314_v51 = vmul.f32 0.17677669, %v1391_v49  ;;  %v4413_v49 = vld [vmem:[#allocation3 + $0x78] sm:$0xff] }
 0x629   : > { %1481 = vmax.xlane.f32.xlu1 %v4308_v48 }
 0x62c   : > { %1479 = vmax.xlane.f32.xlu0 %v4312_v50  ;;  %v2901_v52 = vpop.f32.mrb[40].mxu0 }
 0x62d   : > { %1477 = vmax.xlane.f32.xlu1 %v4314_v51  ;;  %v1404_v53 = vpop.f32.mrb[41].mxu0  ;;  %v4322_v59 = vmul.f32 0.17677669, %v2901_v52 }
 0x62e   : > { %v4318_v54 = vmul.f32 0.17677669, %v1404_v53  ;;  %v2902_v55 = vpop.f32.mrb[42].mxu0 }
 0x62f   : > { %v4320_v57 = vmul.f32 0.17677669, %v2902_v55  ;;  %v1407_v58 = vpop.f32.mrb[43].mxu0 }
 0x630   : > { %1483 = vmax.xlane.f32.xlu0 %v4318_v54  ;;  %v4326_v60 = vmul.f32 0.17677669, %v1407_v58 }
 0x631   : > { %1489 = vmax.xlane.f32.xlu1 %v4320_v57 }
 0x634   : > { %v2905_v61 = vpop.f32.mrb[44].mxu0  ;;  %1487 = vmax.xlane.f32.xlu0 %v4322_v59 }
 0x635   : > { %1485 = vmax.xlane.f32.xlu1 %v4326_v60  ;;  %v1420_v62 = vpop.f32.mrb[45].mxu0  ;;  %v4334_v3 = vmul.f32 0.17677669, %v2905_v61 }
 0x636   : > { %v4330_v63 = vmul.f32 0.17677669, %v1420_v62  ;;  %v2906_v0 = vpop.f32.mrb[46].mxu0  ;;  %v4423_v62 = vld [vmem:[#allocation3 + $0x70] sm:$0xff] }
 0x637   : > { %v4332_v1 = vmul.f32 0.17677669, %v2906_v0  ;;  %v1423_v2 = vpop.f32.mrb[47].mxu0  ;;  %v1464_v0 = vld [vmem:[#allocation3 + $0x68] sm:$0xff] }
 0x638   : > { %1491 = vmax.xlane.f32.xlu0 %v4330_v63  ;;  %v4338_v4 = vmul.f32 0.17677669, %v1423_v2 }
 0x639   : > { %1497 = vmax.xlane.f32.xlu1 %v4332_v1 }
 0x63c   : > { %1495 = vmax.xlane.f32.xlu0 %v4334_v3 }
 0x63d   : > { %1493 = vmax.xlane.f32.xlu1 %v4338_v4 }
 0x6ac   : > { %v1472_v7 = vpop.xlane.xlu1 %1471 }
 0x6ad   : > { %v4345_v8 = vmax.f32 %v4342_v5, %v1472_v7  ;;  %v1468_v9 = vpop.xlane.xlu0 %1467 }
 0x6ae   : > { %v1499_v10 = vmax.f32 %v1451_v6, %v1468_v9 }
 0x6af   : > { %2047 = vst.msk [vmem:[#allocation3 + $0x10] sm:$0xff] %vm1771_vm1, %v4345_v8  ;;  %1575 = vperm.xlu1 %3196, %v4345_v8  }
 0x6b0   : > { %2045 = vst.msk [vmem:[#allocation3] sm:$0xff] %vm1771_vm1, %v1499_v10  ;;  %v1474_v13 = vpop.xlane.xlu1 %1473  ;;  %1565 = vperm.xlu0 %3195, %v1499_v10   ;;  %v1515_v41 = vsub.f32 %v1451_v6, %v1499_v10 }
 0x6b1   : > { %v1502_v14 = vmax.f32 %v4347_v11, %v1474_v13  ;;  %v1470_v15 = vpop.xlane.xlu0 %1469 }
 0x6b2   : > { %v4357_v16 = vmax.f32 %v4352_v12, %v1470_v15  ;;  %v1531_v53 = vmul.f32 1.442695, %v1515_v41  ;;  %v1517_v15 = vsub.f32 %v4342_v5, %v4345_v8 }
 0x6b3   : > { %2048 = vst.msk [vmem:[#allocation3 + $0x18] sm:$0xff] %vm1771_vm1, %v1502_v14  ;;  %1580 = vperm.xlu1 %3196, %v1502_v14   ;;  %v1518_v55 = vsub.f32 %v4347_v11, %v1502_v14 }
 0x6b4   : > { %2046 = vst.msk [vmem:[#allocation3 + $0x8] sm:$0xff] %vm1771_vm1, %v4357_v16  ;;  %v1516_v2 = vsub.f32 %v4352_v12, %v4357_v16  ;;  %3197 = vpow2.f32 %v1531_v53 }
 0x6b5   : > { %v1476_v19 = vpop.xlane.xlu0 %1475  ;;  %v1537_v9 = vmul.f32 1.442695, %v1518_v55 }
 0x6b6   : > { %v4367_v20 = vmax.f32 %v4360_v17, %v1476_v19  ;;  %v1482_v21 = vpop.xlane.xlu1 %1481 }
 0x6b7   : > { %v4370_v22 = vmax.f32 %v4364_v18, %v1482_v21  ;;  %1570 = vperm.xlu1 %3196, %v4357_v16   ;;  %v1533_v16 = vmul.f32 1.442695, %v1516_v2  ;;  %3199 = vpow2.f32 %v1537_v9 }
 0x6b8   : > { %2049 = vst.msk [vmem:[#allocation3 + $0x20] sm:$0xff] %vm1771_vm1, %v4367_v20 }
 0x6b9   : > { %2052 = vst.msk [vmem:[#allocation3 + $0x38] sm:$0xff] %vm1771_vm1, %v4370_v22  ;;  %v1480_v25 = vpop.xlane.xlu0 %1479  ;;  %v1522_v19 = vsub.f32 %v4364_v18, %v4370_v22  ;;  %3201 = vpow2.f32 %v1533_v16 }
 0x6ba   : > { %v4380_v26 = vmax.f32 %v4373_v23, %v1480_v25  ;;  %v1478_v27 = vpop.xlane.xlu1 %1477  ;;  %v1519_v25 = vsub.f32 %v4360_v17, %v4367_v20 }
 0x6bb   : > { %v1504_v28 = vmax.f32 %v1456_v24, %v1478_v27  ;;  %v1545_v27 = vmul.f32 1.442695, %v1522_v19 }
 0x6bc   : > { %2051 = vst.msk [vmem:[#allocation3 + $0x30] sm:$0xff] %vm1771_vm1, %v4380_v26  ;;  %1595 = vperm.xlu1 %3196, %v4380_v26   ;;  %v1539_v18 = vmul.f32 1.442695, %v1519_v25 }
 0x6bd   : > { %2050 = vst.msk [vmem:[#allocation3 + $0x28] sm:$0xff] %vm1771_vm1, %v1504_v28  ;;  %v1484_v32 = vpop.xlane.xlu0 %1483  ;;  %v1520_v10 = vsub.f32 %v1456_v24, %v1504_v28  ;;  %v1535_v24 = vmul.f32 1.442695, %v1517_v15 }
 0x6be   : > { %v1490_v33 = vpop.xlane.xlu1 %1489  ;;  %v4391_v34 = vmax.f32 %v4382_v29, %v1484_v32  ;;  %v4454_v8 = vpop.eup %3197 }
 0x6bf   : > { %v4394_v35 = vmax.f32 %v4387_v30, %v1490_v33  ;;  %v1541_v21 = vmul.f32 1.442695, %v1520_v10 }
 0x6c0   : > { %2053 = vst.msk [vmem:[#allocation3 + $0x40] sm:$0xff] %vm1771_vm1, %v4391_v34  ;;  %1585 = vperm.xlu1 %3196, %v4367_v20  }
 0x6c1   : > { %2056 = vst.msk [vmem:[#allocation3 + $0x58] sm:$0xff] %vm1771_vm1, %v4394_v35  ;;  %v1488_v39 = vpop.xlane.xlu0 %1487  ;;  %3203 = vpow2.f32 %v1541_v21  ;;  %v1526_v5 = vsub.f32 %v4387_v30, %v4394_v35 }
 0x6c2   : > { %v1486_v42 = vpop.xlane.xlu1 %1485  ;;  %v4406_v45 = vmax.f32 %v4396_v36, %v1488_v39  ;;  %3205 = vpow2.f32 %v1535_v24 }
 0x6c3   : > { %v1508_v46 = vmax.f32 %v4401_v37, %v1486_v42  ;;  %3207 = vpow2.f32 %v1545_v27  ;;  %v1553_v17 = vmul.f32 1.442695, %v1526_v5 }
 0x6c4   : > { %2055 = vst.msk [vmem:[#allocation3 + $0x50] sm:$0xff] %vm1771_vm1, %v4406_v45  ;;  %1590 = vperm.xlu1 %3196, %v1504_v28   ;;  %v4461_v28 = vpop.eup %3199  ;;  %3209 = vpow2.f32 %v1539_v18  ;;  %v1525_v32 = vsub.f32 %v4396_v36, %v4406_v45 }
 0x6c5   : > { %2054 = vst.msk [vmem:[#allocation3 + $0x48] sm:$0xff] %vm1771_vm1, %v1508_v46  ;;  %1610 = vperm.xlu0 %3195, %v1508_v46   ;;  %v1492_v52 = vpop.xlane.xlu0 %1491  ;;  %v1524_v20 = vsub.f32 %v4401_v37, %v1508_v46  ;;  %3211 = vpow2.f32 %v1553_v17  ;;  %v1523_v37 = vsub.f32 %v4382_v29, %v4391_v34 }
 0x6c6   : > { %v1498_v56 = vpop.xlane.xlu1 %1497  ;;  %v4418_v58 = vmax.f32 %v4409_v47, %v1492_v52  ;;  %v1551_v39 = vmul.f32 1.442695, %v1525_v32 }
 0x6c7   : > { %v4421_v61 = vmax.f32 %v4413_v49, %v1498_v56  ;;  %v1549_v33 = vmul.f32 1.442695, %v1524_v20 }
 0x6c8   : > { %2057 = vst.msk [vmem:[#allocation3 + $0x60] sm:$0xff] %vm1771_vm1, %v4418_v58  ;;  %1600 = vperm.xlu1 %3196, %v4370_v22   ;;  %v1521_v22 = vsub.f32 %v4373_v23, %v4380_v26  ;;  %v4467_v26 = vpop.eup %3201  ;;  %v1527_v46 = vsub.f32 %v4409_v47, %v4418_v58 }
 0x6c9   : > { %v1530_v6 = vsub.f32 %v4413_v49, %v4421_v61  ;;  %2060 = vst.msk [vmem:[#allocation3 + $0x78] sm:$0xff] %vm1771_vm1, %v4421_v61  ;;  %1620 = vperm.xlu0 %3195, %v4394_v35   ;;  %v1496_v7 = vpop.xlane.xlu0 %1495 }
 0x6ca   : > { %v1494_v11 = vpop.xlane.xlu1 %1493  ;;  %v4436_v13 = vmax.f32 %v4423_v62, %v1496_v7  ;;  %v1543_v30 = vmul.f32 1.442695, %v1521_v22  ;;  %v1555_v52 = vmul.f32 1.442695, %v1527_v46 }
 0x6cb   : > { %v1512_v14 = vmax.f32 %v1464_v0, %v1494_v11  ;;  %v4469_v35 = vpop.eup %3203 }
 0x6cc   : > { %v1529_v12 = vsub.f32 %v4423_v62, %v4436_v13  ;;  %2059 = vst.msk [vmem:[#allocation3 + $0x70] sm:$0xff] %vm1771_vm1, %v4436_v13  ;;  %1605 = vperm.xlu1 %3196, %v4391_v34   ;;  %3213 = vpow2.f32 %v1543_v30  ;;  %v4475_v41 = vpop.eup %3205 }
 0x6cd   : > { %2058 = vst.msk [vmem:[#allocation3 + $0x68] sm:$0xff] %vm1771_vm1, %v1512_v14  ;;  %1630 = vperm.xlu0 %3195, %v1512_v14   ;;  %v1528_v23 = vsub.f32 %v1464_v0, %v1512_v14  ;;  %3215 = vpow2.f32 %v1549_v33  ;;  %v4477_v42 = vpop.eup %3207 }
 0x6ce   : > { %3217 = vpow2.f32 %v1551_v39  ;;  %v4483_v29 = vpop.eup %3209 }
 0x6cf   : > { %v1557_v36 = vmul.f32 1.442695, %v1528_v23  ;;  %v4485_v34 = vpop.eup %3211 }
 0x6d0   : > { %1615 = vperm.xlu1 %3196, %v4406_v45   ;;  %v1547_v45 = vmul.f32 1.442695, %v1523_v37 }
 0x6d1   : > { %1640 = vperm.xlu0 %3195, %v4421_v61   ;;  %3219 = vpow2.f32 %v1557_v36 }
 0x6d2   : > { %3221 = vpow2.f32 %v1547_v45 }
 0x6d3   : > { %3223 = vpow2.f32 %v1555_v52 }
 0x6d4   : > { %1625 = vperm.xlu1 %3196, %v4418_v58  }
 0x6d5   : > { %1806 = vperm.xlu0 %3195, %v4454_v8  }
 0x6d6   : > { %v4489_v53 = vpop.eup %3213 }
 0x6d7   : > { %v4491_v55 = vpop.eup %3215 }
 0x6d8   : > { %1635 = vperm.xlu1 %3196, %v4436_v13   ;;  %v4495_v47 = vpop.eup %3217 }
 0x6d9   : > { %1821 = vperm.xlu0 %3195, %v4461_v28  }
 0x6db   : > { %v4497_v56 = vpop.eup %3219 }
 0x6dc   : > { %1811 = vperm.xlu1 %3196, %v4467_v26   ;;  %v4501_v58 = vpop.eup %3221 }
 0x6dd   : > { %1831 = vperm.xlu0 %3195, %v4469_v35   ;;  %v4504_v0 = vpop.eup %3223 }
 0x6e0   : > { %1816 = vperm.xlu1 %3196, %v4475_v41  }
 0x6e1   : > { %1841 = vperm.xlu0 %3195, %v4477_v42  }
 0x6e4   : > { %1826 = vperm.xlu1 %3196, %v4483_v29  }
 0x6e5   : > { %1861 = vperm.xlu0 %3195, %v4485_v34  }
 0x6e8   : > { %1836 = vperm.xlu1 %3196, %v4489_v53  }
 0x6e9   : > { %1851 = vperm.xlu0 %3195, %v4491_v55  }
 0x6ec   : > { %1856 = vperm.xlu1 %3196, %v4495_v47  }
 0x6ed   : > { %1871 = vperm.xlu0 %3195, %v4497_v56  }
 0x6f0   : > { %1846 = vperm.xlu1 %3196, %v4501_v58  }
 0x6f4   : > { %1866 = vperm.xlu1 %3196, %v4504_v0  }
 0x72e   : > { %v1576_v2 = vpop.permute.xlu1 %1575 }
 0x72f   : > { %v1645_v7 = vsub.f32 %v4294_v38, %v1576_v2  ;;  %v1566_v9 = vpop.permute.xlu0 %1565 }
 0x730   : > { %v1643_v10 = vsub.f32 %v4296_v40, %v1566_v9 }
 0x731   : > { %v1663_v11 = vmul.f32 1.442695, %v1645_v7 }
 0x732   : > { %v1659_v14 = vmul.f32 1.442695, %v1643_v10  ;;  %v1581_v15 = vpop.permute.xlu1 %1580 }
 0x733   : > { %3225 = vpow2.f32 %v1663_v11  ;;  %v1646_v16 = vsub.f32 %v4300_v43, %v1581_v15 }
 0x734   : > { %3227 = vpow2.f32 %v1659_v14 }
 0x735   : > { %v1665_v19 = vmul.f32 1.442695, %v1646_v16 }
 0x736   : > { %v1571_v21 = vpop.permute.xlu1 %1570 }
 0x737   : > { %3229 = vpow2.f32 %v1665_v19  ;;  %v1644_v24 = vsub.f32 %v4302_v44, %v1571_v21 }
 0x739   : > { %v1661_v25 = vmul.f32 1.442695, %v1644_v24 }
 0x73b   : > { %3231 = vpow2.f32 %v1661_v25  ;;  %v1596_v27 = vpop.permute.xlu1 %1595 }
 0x73c   : > { %v1649_v38 = vsub.f32 %v4312_v50, %v1596_v27 }
 0x73d   : > { %v3226_v5 = vpop.eup %3225 }
 0x73e   : > { %v3228_v18 = vpop.eup %3227  ;;  %v1671_v40 = vmul.f32 1.442695, %v1649_v38  ;;  %1727 = vadd.xlane.f32.xlu0 %v3226_v5 }
 0x73f   : > { %1723 = vadd.xlane.f32.xlu1 %v3228_v18  ;;  %v1586_v22 = vpop.permute.xlu1 %1585 }
 0x740   : > { %3233 = vpow2.f32 %v1671_v40  ;;  %v1647_v43 = vsub.f32 %v4306_v31, %v1586_v22 }
 0x741   : > { %v3230_v17 = vpop.eup %3229 }
 0x742   : > { %v1667_v20 = vmul.f32 1.442695, %v1647_v43  ;;  %v1901_v36 = vpack.c.bf16 %v3230_v17, %v3226_v5 }
 0x743   : > { %1729 = vadd.xlane.f32.xlu1 %v3230_v17  ;;  %v1591_v30 = vpop.permute.xlu1 %1590 }
 0x744   : > { %3235 = vpow2.f32 %v1667_v20  ;;  %v1648_v44 = vsub.f32 %v4314_v51, %v1591_v30  ;;  %v1611_v32 = vpop.permute.xlu0 %1610 }
 0x745   : > { %v3232_v33 = vpop.eup %3231  ;;  %v1652_v37 = vsub.f32 %v4326_v60, %v1611_v32 }
 0x746   : > { %v1669_v23 = vmul.f32 1.442695, %v1648_v44  ;;  %1725 = vadd.xlane.f32.xlu0 %v3232_v33  ;;  %v1900_v50 = vpack.c.bf16 %v3232_v33, %v3228_v18 }
 0x747   : > { %v1601_v39 = vpop.permute.xlu1 %1600  ;;  %v1677_v2 = vmul.f32 1.442695, %v1652_v37 }
 0x748   : > { %3237 = vpow2.f32 %v1669_v23  ;;  %v1650_v45 = vsub.f32 %v4308_v48, %v1601_v39  ;;  %v1621_v31 = vpop.permute.xlu0 %1620  ;;  %2923 = vmatprep.mubr.bf16.mxu1 %v1900_v50  ;;  %v1559_v39 = vmul.f32 1.442695, %v1529_v12 }
 0x749   : > { %2924 = vmatmul.mubr.bf16.vlgmr.msra.gmra.mrb[32].mxu1 %v1901_v36  ;;  %v1654_v51 = vsub.f32 %v4320_v57, %v1621_v31  ;;  %v1561_v36 = vmul.f32 1.442695, %v1530_v6 }
 0x74a   : > { %v3234_v46 = vpop.eup %3233  ;;  %v1673_v52 = vmul.f32 1.442695, %v1650_v45 }
 0x74b   : > { %1735 = vadd.xlane.f32.xlu0 %v3234_v46  ;;  %v1606_v7 = vpop.permute.xlu1 %1605  ;;  %v1681_v14 = vmul.f32 1.442695, %v1654_v51 }
 0x74c   : > { %3239 = vpow2.f32 %v1673_v52  ;;  %v1651_v9 = vsub.f32 %v4318_v54, %v1606_v7  ;;  %v1631_v10 = vpop.permute.xlu0 %1630 }
 0x74d   : > { %3241 = vpow2.f32 %v1677_v2  ;;  %v1656_v48 = vsub.f32 %v4338_v4, %v1631_v10 }
 0x74e   : > { %v3236_v60 = vpop.eup %3235  ;;  %v1675_v11 = vmul.f32 1.442695, %v1651_v9 }
 0x74f   : > { %1731 = vadd.xlane.f32.xlu0 %v3236_v60  ;;  %v1616_v15 = vpop.permute.xlu1 %1615  ;;  %v1685_v24 = vmul.f32 1.442695, %v1656_v48 }
 0x750   : > { %3243 = vpow2.f32 %v1675_v11  ;;  %v1653_v16 = vsub.f32 %v4322_v59, %v1616_v15  ;;  %v1641_v19 = vpop.permute.xlu0 %1640 }
 0x751   : > { %3245 = vpow2.f32 %v1681_v14  ;;  %v1658_v25 = vsub.f32 %v4332_v1, %v1641_v19  ;;  %v1691_v14 = vld [vmem:[#allocation4] sm:$0xff] }
 0x752   : > { %v3238_v21 = vpop.eup %3237  ;;  %v1679_v57 = vmul.f32 1.442695, %v1653_v16  ;;  %v1707_v16 = vmul.f32 %v4454_v8, %v1691_v14  ;;  %v1697_v8 = vld [vmem:[#allocation4 + $0x30] sm:$0xff] }
 0x753   : > { %v1626_v54 = vpop.permute.xlu1 %1625  ;;  %v1902_v27 = vpack.c.bf16 %v3238_v21, %v3236_v60  ;;  %v1689_v18 = vmul.f32 1.442695, %v1658_v25  ;;  %v1693_v60 = vld [vmem:[#allocation4 + $0x10] sm:$0xff] }
 0x754   : > { %3247 = vpow2.f32 %v1679_v57  ;;  %v1655_v38 = vsub.f32 %v4330_v63, %v1626_v54  ;;  %v1709_v48 = vmul.f32 %v4475_v41, %v1693_v60  ;;  %v1694_v57 = vld [vmem:[#allocation4 + $0x18] sm:$0xff]  ;;  %v1692_v54 = vld [vmem:[#allocation4 + $0x8] sm:$0xff] }
 0x755   : > { %2927 = vmatprep.mubr.bf16.mxu1 %v1902_v27  ;;  %3249 = vpow2.f32 %v1685_v24  ;;  %v1710_v25 = vmul.f32 %v4461_v28, %v1694_v57 }
 0x756   : > { %v3240_v5 = vpop.eup %3239  ;;  %v1683_v4 = vmul.f32 1.442695, %v1655_v38 }
 0x757   : > { %1737 = vadd.xlane.f32.xlu1 %v3240_v5  ;;  %v1636_v40 = vpop.permute.xlu1 %1635  ;;  %v1903_v59 = vpack.c.bf16 %v3240_v5, %v3234_v46  ;;  %v3242_v43 = vpop.eup %3241  ;;  %v1708_v5 = vmul.f32 %v4467_v26, %v1692_v54  ;;  %v1698_v26 = vld [vmem:[#allocation4 + $0x38] sm:$0xff]  ;;  %v1703_v54 = vld [vmem:[#allocation4 + $0x60] sm:$0xff] }
 0x758   : > { %3251 = vpow2.f32 %v1683_v4  ;;  %v1657_v22 = vsub.f32 %v4334_v3, %v1636_v40  ;;  %v4535_v46 = vpop.permute.xlu0 %1806 }
 0x759   : > { %2928 = vmatmul.mubr.bf16.gmra.mrb[36].mxu1 %v1903_v59  ;;  %3253 = vpow2.f32 %v1689_v18  ;;  %v1713_v18 = vmul.f32 %v4489_v53, %v1697_v8  ;;  %v1695_v59 = vld [vmem:[#allocation4 + $0x20] sm:$0xff] }
 0x75a   : > { %v3244_v17 = vpop.eup %3243  ;;  %v1687_v1 = vmul.f32 1.442695, %v1657_v22  ;;  %v1711_v28 = vmul.f32 %v4483_v29, %v1695_v59  ;;  %v1789_v59 = vld [vmem:[#allocation5 + $0x8] sm:$0xff] }
 0x75b   : > { %1733 = vadd.xlane.f32.xlu1 %v3238_v21  ;;  %v1904_v20 = vpack.c.bf16 %v3242_v43, %v3244_v17  ;;  %v3246_v63 = vpop.eup %3245  ;;  %v4537_v52 = vpop.permute.xlu1 %1811 }
 0x75c   : > { %3255 = vpow2.f32 %v1687_v1  ;;  %v4539_v62 = vpop.permute.xlu0 %1821  ;;  %v1714_v1 = vmul.f32 %v4477_v42, %v1698_v26  ;;  %v1699_v42 = vld [vmem:[#allocation4 + $0x40] sm:$0xff]  ;;  %v1885_v26 = vmul.f32 %v4537_v52, %v1789_v59 }
 0x75d   : > { %2931 = vmatprep.mubr.bf16.mxu1 %v1904_v20  ;;  %3257 = vpow2.f32 %v1559_v39  ;;  %v1700_v39 = vld [vmem:[#allocation4 + $0x48] sm:$0xff] }
 0x75e   : > { %v3248_v30 = vpop.eup %3247  ;;  %3259 = vpow2.f32 %v1561_v36  ;;  %v1716_v14 = vmul.f32 %v4491_v55, %v1700_v39 }
 0x75f   : > { %1745 = vadd.xlane.f32.xlu1 %v3246_v63  ;;  %1743 = vadd.xlane.f32.xlu0 %v3248_v30  ;;  %v1905_v44 = vpack.c.bf16 %v3246_v63, %v3248_v30  ;;  %v3250_v32 = vpop.eup %3249  ;;  %v4541_v13 = vpop.permute.xlu1 %1816  ;;  %v1696_v63 = vld [vmem:[#allocation4 + $0x28] sm:$0xff] }
 0x760   : > { %v4543_v12 = vpop.permute.xlu0 %1831  ;;  %v1712_v53 = vmul.f32 %v4469_v35, %v1696_v63  ;;  %v1715_v35 = vmul.f32 %v4501_v58, %v1699_v42  ;;  %v1704_v58 = vld [vmem:[#allocation4 + $0x68] sm:$0xff] }
 0x761   : > { %2932 = vmatmul.mubr.bf16.gmra.mrb[40].mxu1 %v1905_v44 }
 0x762   : > { %v3252_v33 = vpop.eup %3251 }
 0x763   : > { %1741 = vadd.xlane.f32.xlu1 %v3242_v43  ;;  %1739 = vadd.xlane.f32.xlu0 %v3244_v17  ;;  %v1906_v3 = vpack.c.bf16 %v3250_v32, %v3252_v33  ;;  %v3254_v23 = vpop.eup %3253  ;;  %v4545_v49 = vpop.permute.xlu1 %1826 }
 0x764   : > { %v4547_v61 = vpop.permute.xlu0 %1841 }
 0x765   : > { %2935 = vmatprep.mubr.bf16.mxu1 %v1906_v3 }
 0x766   : > { %v3256_v50 = vpop.eup %3255 }
 0x767   : > { %1753 = vadd.xlane.f32.xlu1 %v3254_v23  ;;  %1751 = vadd.xlane.f32.xlu0 %v3256_v50  ;;  %v1907_v37 = vpack.c.bf16 %v3254_v23, %v3256_v50  ;;  %v4529_v45 = vpop.eup %3257  ;;  %v4549_v6 = vpop.permute.xlu1 %1836 }
 0x768   : > { %v4532_v31 = vpop.eup %3259  ;;  %v4551_v2 = vpop.permute.xlu0 %1861 }
 0x769   : > { %2936 = vmatmul.mubr.bf16.gmra.mrb[44].mxu1 %v1907_v37 }
 0x76b   : > { %1749 = vadd.xlane.f32.xlu1 %v3250_v32  ;;  %1747 = vadd.xlane.f32.xlu0 %v3252_v33  ;;  %v4553_v51 = vpop.permute.xlu1 %1856  ;;  %v1701_v32 = vld [vmem:[#allocation4 + $0x50] sm:$0xff]  ;;  %v1702_v33 = vld [vmem:[#allocation4 + $0x58] sm:$0xff] }
 0x76c   : > { %v4555_v7 = vpop.permute.xlu0 %1851  ;;  %v1717_v29 = vmul.f32 %v4495_v47, %v1701_v32  ;;  %v1718_v23 = vmul.f32 %v4485_v34, %v1702_v33  ;;  %v1706_v47 = vld [vmem:[#allocation4 + $0x78] sm:$0xff] }
 0x76d   : > { %v1722_v57 = vmul.f32 %v4532_v31, %v1706_v47  ;;  %v1795_v32 = vld [vmem:[#allocation5 + $0x38] sm:$0xff] }
 0x76e   : > { %v1891_v52 = vmul.f32 %v4547_v61, %v1795_v32 }
 0x76f   : > { %v4557_v9 = vpop.permute.xlu1 %1846 }
 0x770   : > { %v4559_v10 = vpop.permute.xlu0 %1871 }
 0x773   : > { %v4561_v11 = vpop.permute.xlu1 %1866 }
 0x77c   : > { %1876 = vperm.xlu1 %3196, %v4529_v45  }
 0x781   : > { %1881 = vperm.xlu0 %3195, %v4532_v31   ;;  %v1790_v31 = vld [vmem:[#allocation5 + $0x10] sm:$0xff] }
 0x7cb   : > { %v1728_v15 = vpop.xlane.xlu0 %1727 }
 0x7cc   : > { %v1757_v19 = vadd.f32 %v1728_v15, %v1709_v48  ;;  %v1724_v21 = vpop.xlane.xlu1 %1723 }
 0x7cd   : > { %v1755_v24 = vadd.f32 %v1724_v21, %v1707_v16  ;;  %v1705_v16 = vld [vmem:[#allocation4 + $0x70] sm:$0xff] }
 0x7ce   : > { %1774 = vst.msk [vmem:[#allocation4 + $0x10] sm:$0xff] %vm1771_vm1, %v1757_v19  ;;  %v1721_v21 = vmul.f32 %v4529_v45, %v1705_v16 }
 0x7cf   : > { %1772 = vst.msk [vmem:[#allocation4] sm:$0xff] %vm1771_vm1, %v1755_v24 }
 0x7d0   : > { %v1730_v27 = vpop.xlane.xlu1 %1729 }
 0x7d1   : > { %v1758_v38 = vadd.f32 %v1730_v27, %v1710_v25 }
 0x7d3   : > { %1775 = vst.msk [vmem:[#allocation4 + $0x18] sm:$0xff] %vm1771_vm1, %v1758_v38  ;;  %v1726_v41 = vpop.xlane.xlu0 %1725  ;;  %v1719_v38 = vmul.f32 %v4504_v0, %v1703_v54 }
 0x7d4   : > { %v1756_v4 = vadd.f32 %v1726_v41, %v1708_v5  ;;  %v1720_v5 = vmul.f32 %v4497_v56, %v1704_v58 }
 0x7d6   : > { %1773 = vst.msk [vmem:[#allocation4 + $0x8] sm:$0xff] %vm1771_vm1, %v1756_v4 }
 0x7d8   : > { %v1736_v40 = vpop.xlane.xlu0 %1735 }
 0x7d9   : > { %v1761_v22 = vadd.f32 %v1736_v40, %v1713_v18  ;;  %v1788_v18 = vld [vmem:[#allocation5] sm:$0xff]  ;;  %v1791_v40 = vld [vmem:[#allocation5 + $0x18] sm:$0xff] }
 0x7da   : > { %v1887_v0 = vmul.f32 %v4539_v62, %v1791_v40 }
 0x7db   : > { %1778 = vst.msk [vmem:[#allocation4 + $0x30] sm:$0xff] %vm1771_vm1, %v1761_v22  ;;  %v1886_v22 = vmul.f32 %v4541_v13, %v1790_v31  ;;  %v1792_v13 = vld [vmem:[#allocation5 + $0x20] sm:$0xff] }
 0x7dc   : > { %v1732_v43 = vpop.xlane.xlu0 %1731  ;;  %v1888_v62 = vmul.f32 %v4545_v49, %v1792_v13  ;;  %v1797_v49 = vld [vmem:[#allocation5 + $0x48] sm:$0xff] }
 0x7dd   : > { %v1759_v17 = vadd.f32 %v1732_v43, %v1711_v28  ;;  %v1884_v28 = vmul.f32 %v4535_v46, %v1788_v18  ;;  %v1793_v46 = vld [vmem:[#allocation5 + $0x28] sm:$0xff] }
 0x7df   : > { %1776 = vst.msk [vmem:[#allocation4 + $0x20] sm:$0xff] %vm1771_vm1, %v1759_v17 }
 0x7e4   : > { %v1738_v20 = vpop.xlane.xlu1 %1737 }
 0x7e5   : > { %v1762_v30 = vadd.f32 %v1738_v20, %v1714_v1 }
 0x7e7   : > { %1779 = vst.msk [vmem:[#allocation4 + $0x38] sm:$0xff] %vm1771_vm1, %v1762_v30 }
 0x7e8   : > { %v1734_v44 = vpop.xlane.xlu1 %1733 }
 0x7e9   : > { %v1760_v3 = vadd.f32 %v1734_v44, %v1712_v53  ;;  %v1794_v44 = vld [vmem:[#allocation5 + $0x30] sm:$0xff] }
 0x7ea   : > { %v1890_v33 = vmul.f32 %v4549_v6, %v1794_v44  ;;  %v1799_v6 = vld [vmem:[#allocation5 + $0x58] sm:$0xff]  ;;  %v2222_v44 = vld [vmem:[#allocation18 + $0x28] sm:$0xff] (!%p2580_p5) }
 0x7eb   : > { %1777 = vst.msk [vmem:[#allocation4 + $0x28] sm:$0xff] %vm1771_vm1, %v1760_v3 }
 0x7ec   : > { %v1744_v50 = vpop.xlane.xlu0 %1743  ;;  %v1746_v37 = vpop.xlane.xlu1 %1745 }
 0x7ed   : > { %v1765_v36 = vadd.f32 %v1744_v50, %v1717_v29  ;;  %v1766_v60 = vadd.f32 %v1746_v37, %v1718_v23  ;;  %v1889_v50 = vmul.f32 %v4543_v12, %v1793_v46  ;;  %v1895_v12 = vmul.f32 %v4551_v2, %v1799_v6 }
 0x7ef   : > { %1782 = vst.msk [vmem:[#allocation4 + $0x50] sm:$0xff] %vm1771_vm1, %v1765_v36  ;;  %1783 = vst.msk [vmem:[#allocation4 + $0x58] sm:$0xff] %vm1771_vm1, %v1766_v60  ;;  %v1798_v60 = vld [vmem:[#allocation5 + $0x50] sm:$0xff] }
 0x7f0   : > { %v1740_v48 = vpop.xlane.xlu0 %1739  ;;  %v1742_v15 = vpop.xlane.xlu1 %1741 }
 0x7f1   : > { %v1763_v19 = vadd.f32 %v1740_v48, %v1715_v35  ;;  %v1764_v34 = vadd.f32 %v1742_v15, %v1716_v14  ;;  %v1796_v14 = vld [vmem:[#allocation5 + $0x40] sm:$0xff]  ;;  %v1894_v48 = vmul.f32 %v4553_v51, %v1798_v60  ;;  %v1803_v51 = vld [vmem:[#allocation5 + $0x78] sm:$0xff] }
 0x7f2   : > { %v1892_v61 = vmul.f32 %v4557_v9, %v1796_v14 }
 0x7f3   : > { %1780 = vst.msk [vmem:[#allocation4 + $0x40] sm:$0xff] %vm1771_vm1, %v1763_v19  ;;  %1781 = vst.msk [vmem:[#allocation4 + $0x48] sm:$0xff] %vm1771_vm1, %v1764_v34  ;;  %v1893_v19 = vmul.f32 %v4555_v7, %v1797_v49 }
 0x7f4   : > { %v1752_v24 = vpop.xlane.xlu0 %1751  ;;  %v1754_v25 = vpop.xlane.xlu1 %1753 }
 0x7f5   : > { %v1769_v27 = vadd.f32 %v1752_v24, %v1721_v21  ;;  %v1770_v55 = vadd.f32 %v1754_v25, %v1722_v57  ;;  %v1802_v25 = vld [vmem:[#allocation5 + $0x70] sm:$0xff] }
 0x7f6   : > { %v2092_v13 = vld [vmem:[#allocation4 + $0x58] sm:$0xff] (!%p2580_p5)  ;;  %v2091_v32 = vld [vmem:[#allocation4 + $0x50] sm:$0xff] (!%p2580_p5) }
 0x7f7   : > { %1786 = vst.msk [vmem:[#allocation4 + $0x70] sm:$0xff] %vm1771_vm1, %v1769_v27  ;;  %1787 = vst.msk [vmem:[#allocation4 + $0x78] sm:$0xff] %vm1771_vm1, %v1770_v55  ;;  %v1800_v27 = vld [vmem:[#allocation5 + $0x60] sm:$0xff]  ;;  %v1801_v55 = vld [vmem:[#allocation5 + $0x68] sm:$0xff] }
 0x7f8   : > { %v1748_v41 = vpop.xlane.xlu0 %1747  ;;  %v1750_v4 = vpop.xlane.xlu1 %1749 }
 0x7f9   : > { %v1767_v8 = vadd.f32 %v1748_v41, %v1719_v38  ;;  %v1768_v45 = vadd.f32 %v1750_v4, %v1720_v5  ;;  %v1896_v38 = vmul.f32 %v4561_v11, %v1800_v27  ;;  %v2081_v11 = vld [vmem:[#allocation4] sm:$0xff] (!%p2580_p5)  ;;  %v2231_v27 = vld [vmem:[#allocation18 + $0x70] sm:$0xff] (!%p2580_p5) }
 0x7fb   : > { %1784 = vst.msk [vmem:[#allocation4 + $0x60] sm:$0xff] %vm1771_vm1, %v1767_v8  ;;  %1785 = vst.msk [vmem:[#allocation4 + $0x68] sm:$0xff] %vm1771_vm1, %v1768_v45  ;;  %v1897_v8 = vmul.f32 %v4559_v10, %v1801_v55  ;;  %v2082_v10 = vld [vmem:[#allocation4 + $0x8] sm:$0xff] (!%p2580_p5) }
 0x7fc   : > { %v1877_v54 = vpop.permute.xlu1 %1876 }
 0x7fd   : > { %v1898_v2 = vmul.f32 %v1877_v54, %v1802_v25 }
 0x7fe   : > { %v2095_v25 = vld [vmem:[#allocation4 + $0x70] sm:$0xff] (!%p2580_p5) }
 0x800   : > { %v1882_v9 = vpop.permute.xlu0 %1881 }
 0x801   : > { %v1899_v7 = vmul.f32 %v1882_v9, %v1803_v51  ;;  %v2232_v51 = vld [vmem:[#allocation18 + $0x78] sm:$0xff] (!%p2580_p5) }
 0x802   : > { %v2094_v60 = vld [vmem:[#allocation4 + $0x68] sm:$0xff] (!%p2580_p5)  ;;  %v2093_v14 = vld [vmem:[#allocation4 + $0x60] sm:$0xff] (!%p2580_p5) }
 0x81c   : > { %v2925_v43 = vpop.f32.mrb[32].mxu1 }
 0x81d   : > { %v2015_v56 = vadd.f32 %v2925_v43, %v1886_v22  ;;  %v1950_v17 = vpop.f32.mrb[33].mxu1  ;;  %v2089_v22 = vld [vmem:[#allocation4 + $0x40] sm:$0xff] (!%p2580_p5)  ;;  %v3696_v43 = vmov (!%p2580_p5), 0  }
 0x81e   : > { %v2013_v1 = vadd.f32 %v1950_v17, %v1884_v28  ;;  %v2926_v20 = vpop.f32.mrb[34].mxu1  ;;  %v2090_v28 = vld [vmem:[#allocation4 + $0x48] sm:$0xff] (!%p2580_p5)  ;;  %3262 = vset.pattern.permute.xlu1 (!%p2580_p5), %v3696_v43  ;;  %3261 = vset.pattern.permute.xlu0 (!%p2580_p5), %v3696_v43  ;;  %3263 = vrcp.f32 (!%p2580_p5), %v2089_v22  ;;  %v2217_v17 = vld [vmem:[#allocation18] sm:$0xff] (!%p2580_p5) }
 0x81f   : > { %2031 = vst [vmem:[#allocation5 + $0x10] sm:$0xff] %v2015_v56  ;;  %v2016_v63 = vadd.f32 %v2926_v20, %v1887_v0  ;;  %v1953_v30 = vpop.f32.mrb[35].mxu1  ;;  %3265 = vrcp.f32 (!%p2580_p5), %v2081_v11  ;;  %v2084_v0 = vld [vmem:[#allocation4 + $0x18] sm:$0xff] (!%p2580_p5)  ;;  %v2083_v56 = vld [vmem:[#allocation4 + $0x10] sm:$0xff] (!%p2580_p5) }
 0x820   : > { %2029 = vst [vmem:[#allocation5] sm:$0xff] %v2013_v1  ;;  %v2014_v53 = vadd.f32 %v1953_v30, %v1885_v26  ;;  %3267 = vrcp.f32 (!%p2580_p5), %v2090_v28  ;;  %v2218_v26 = vld [vmem:[#allocation18 + $0x8] sm:$0xff] (!%p2580_p5)  ;;  %v2219_v20 = vld [vmem:[#allocation18 + $0x10] sm:$0xff] (!%p2580_p5) }
 0x821   : > { %2032 = vst [vmem:[#allocation5 + $0x18] sm:$0xff] %v2016_v63  ;;  %3269 = vrcp.f32 (!%p2580_p5), %v2082_v10  ;;  %v2233_v1 = vpack.c.bf16 (!%p2580_p5), %v2218_v26, %v2217_v17  ;;  %v2220_v63 = vld [vmem:[#allocation18 + $0x18] sm:$0xff] (!%p2580_p5) }
 0x822   : > { %2030 = vst [vmem:[#allocation5 + $0x8] sm:$0xff] %v2014_v53  ;;  %3271 = vrcp.f32 (!%p2580_p5), %v2084_v0  ;;  %v2234_v30 = vpack.c.bf16 (!%p2580_p5), %v2220_v63, %v2219_v20  ;;  %v2221_v53 = vld [vmem:[#allocation18 + $0x20] sm:$0xff] (!%p2580_p5) }
 0x823   : > { %3273 = vrcp.f32 (!%p2580_p5), %v2083_v56  ;;  %2939 = vmatprep.subr.bf16.mxu0 (!%p2580_p5), %v2233_v1  ;;  %2987 = vmatprep.subr.bf16.mxu1 (!%p2580_p5), %v2233_v1  ;;  %v2235_v46 = vpack.c.bf16 (!%p2580_p5), %v2222_v44, %v2221_v53 }
 0x824   : > { %2940 = vmatpush3.bf16.msra.mxu0 (!%p2580_p5), %v2233_v1  ;;  %2995 = vmatpush3.bf16.msra.mxu1 (!%p2580_p5), %v2233_v1  ;;  %3275 = vrcp.f32 (!%p2580_p5), %v2092_v13 }
 0x825   : > { %2941 = vmatprep.subr.bf16.mxu0 (!%p2580_p5), %v2234_v30  ;;  %2988 = vmatprep.subr.bf16.mxu1 (!%p2580_p5), %v2234_v30  ;;  %3277 = vrcp.f32 (!%p2580_p5), %v2091_v32 }
 0x826   : > { %v2067_v56 = vld [vmem:[#allocation5 + $0x10] sm:$0xff] (!%p2580_p5) }
 0x828   : > { %2942 = vmatpush3.bf16.msra.mxu0 (!%p2580_p5), %v2234_v30  ;;  %2996 = vmatpush3.bf16.msra.mxu1 (!%p2580_p5), %v2234_v30  ;;  %v2068_v0 = vld [vmem:[#allocation5 + $0x18] sm:$0xff] (!%p2580_p5) }
 0x829   : > { %2943 = vmatprep.subr.bf16.mxu0 (!%p2580_p5), %v2235_v46  ;;  %2989 = vmatprep.subr.bf16.mxu1 (!%p2580_p5), %v2235_v46 }
 0x82c   : > { %v2929_v3 = vpop.f32.mrb[36].mxu1  ;;  %2944 = vmatpush3.bf16.msra.mxu0 (!%p2580_p5), %v2235_v46  ;;  %2997 = vmatpush3.bf16.msra.mxu1 (!%p2580_p5), %v2235_v46 }
 0x82d   : > { %v2019_v29 = vadd.f32 %v2929_v3, %v1890_v33  ;;  %v1966_v23 = vpop.f32.mrb[37].mxu1  ;;  %v3264_v33 = vpop.eup (!%p2580_p5), %3263  ;;  %v2224_v3 = vld [vmem:[#allocation18 + $0x38] sm:$0xff] (!%p2580_p5) }
 0x82e   : > { %v2017_v37 = vadd.f32 %v1966_v23, %v1888_v62  ;;  %v2930_v42 = vpop.f32.mrb[38].mxu1  ;;  %v2223_v62 = vld [vmem:[#allocation18 + $0x30] sm:$0xff] (!%p2580_p5)  ;;  %2155 = vperm.xlu1 (!%p2580_p5), %3262, %v3264_v33  }
 0x82f   : > { %2035 = vst [vmem:[#allocation5 + $0x30] sm:$0xff] %v2019_v29  ;;  %v2020_v39 = vadd.f32 %v2930_v42, %v1891_v52  ;;  %v1969_v36 = vpop.f32.mrb[39].mxu1  ;;  %v3266_v52 = vpop.eup (!%p2580_p5), %3265  ;;  %v2086_v29 = vld [vmem:[#allocation4 + $0x28] sm:$0xff] (!%p2580_p5)  ;;  %v2236_v42 = vpack.c.bf16 (!%p2580_p5), %v2224_v3, %v2223_v62 }
 0x830   : > { %2033 = vst [vmem:[#allocation5 + $0x20] sm:$0xff] %v2017_v37  ;;  %v2018_v35 = vadd.f32 %v1969_v36, %v1889_v50  ;;  %v3268_v23 = vpop.eup (!%p2580_p5), %3267  ;;  %2115 = vperm.xlu0 (!%p2580_p5), %3261, %v3266_v52   ;;  %v2085_v50 = vld [vmem:[#allocation4 + $0x20] sm:$0xff] (!%p2580_p5)  ;;  %3279 = vrcp.f32 (!%p2580_p5), %v2086_v29  ;;  %v2226_v36 = vld [vmem:[#allocation18 + $0x48] sm:$0xff] (!%p2580_p5) }
 0x831   : > { %2036 = vst [vmem:[#allocation5 + $0x38] sm:$0xff] %v2020_v39  ;;  %v3270_v37 = vpop.eup (!%p2580_p5), %3269  ;;  %v2225_v39 = vld [vmem:[#allocation18 + $0x40] sm:$0xff] (!%p2580_p5)  ;;  %3281 = vrcp.f32 (!%p2580_p5), %v2085_v50  ;;  %2945 = vmatprep.subr.bf16.mxu0 (!%p2580_p5), %v2236_v42  ;;  %2990 = vmatprep.subr.bf16.mxu1 (!%p2580_p5), %v2236_v42 }
 0x832   : > { %2034 = vst [vmem:[#allocation5 + $0x28] sm:$0xff] %v2018_v35  ;;  %2160 = vperm.xlu1 (!%p2580_p5), %3262, %v3268_v23   ;;  %v3272_v35 = vpop.eup (!%p2580_p5), %3271  ;;  %v2237_v49 = vpack.c.bf16 (!%p2580_p5), %v2226_v36, %v2225_v39  ;;  %3283 = vrcp.f32 (!%p2580_p5), %v2094_v60  ;;  %2946 = vmatpush3.bf16.msra.mxu0 (!%p2580_p5), %v2236_v42 }
 0x833   : > { %v3274_v6 = vpop.eup (!%p2580_p5), %3273  ;;  %3285 = vrcp.f32 (!%p2580_p5), %v2093_v14  ;;  %2998 = vmatpush3.bf16.msra.mxu1 (!%p2580_p5), %v2236_v42 }
 0x834   : > { %v2933_v15 = vpop.f32.mrb[40].mxu1  ;;  %2120 = vperm.xlu0 (!%p2580_p5), %3261, %v3270_v37   ;;  %2947 = vmatprep.subr.bf16.mxu0 (!%p2580_p5), %v2237_v49 }
 0x835   : > { %v2023_v16 = vadd.f32 %v2933_v15, %v1894_v48  ;;  %v1982_v47 = vpop.f32.mrb[41].mxu1  ;;  %v2227_v48 = vld [vmem:[#allocation18 + $0x50] sm:$0xff] (!%p2580_p5)  ;;  %v2088_v15 = vld [vmem:[#allocation4 + $0x38] sm:$0xff] (!%p2580_p5)  ;;  %2991 = vmatprep.subr.bf16.mxu1 (!%p2580_p5), %v2237_v49 }
 0x836   : > { %v2021_v34 = vadd.f32 %v1982_v47, %v1892_v61  ;;  %v2934_v21 = vpop.f32.mrb[42].mxu1  ;;  %v2228_v61 = vld [vmem:[#allocation18 + $0x58] sm:$0xff] (!%p2580_p5)  ;;  %2130 = vperm.xlu1 (!%p2580_p5), %3262, %v3272_v35   ;;  %3287 = vrcp.f32 (!%p2580_p5), %v2088_v15  ;;  %2948 = vmatpush3.bf16.msra.mxu0 (!%p2580_p5), %v2237_v49 }
 0x837   : > { %2039 = vst [vmem:[#allocation5 + $0x50] sm:$0xff] %v2023_v16  ;;  %v2024_v57 = vadd.f32 %v2934_v21, %v1895_v12  ;;  %v1985_v24 = vpop.f32.mrb[43].mxu1  ;;  %v3276_v12 = vpop.eup (!%p2580_p5), %3275  ;;  %v2087_v16 = vld [vmem:[#allocation4 + $0x30] sm:$0xff] (!%p2580_p5)  ;;  %v2230_v21 = vld [vmem:[#allocation18 + $0x68] sm:$0xff] (!%p2580_p5)  ;;  %2999 = vmatpush3.bf16.msra.mxu1 (!%p2580_p5), %v2237_v49  ;;  %v2069_v52 = vld [vmem:[#allocation5 + $0x20] sm:$0xff] (!%p2580_p5) }
 0x838   : > { %2037 = vst [vmem:[#allocation5 + $0x40] sm:$0xff] %v2021_v34  ;;  %v2022_v58 = vadd.f32 %v1985_v24, %v1893_v19  ;;  %2125 = vperm.xlu0 (!%p2580_p5), %3261, %v3274_v6   ;;  %v3278_v47 = vpop.eup (!%p2580_p5), %3277  ;;  %v2238_v19 = vpack.c.bf16 (!%p2580_p5), %v2228_v61, %v2227_v48  ;;  %v2229_v34 = vld [vmem:[#allocation18 + $0x60] sm:$0xff] (!%p2580_p5)  ;;  %3289 = vrcp.f32 (!%p2580_p5), %v2087_v16  ;;  %v2072_v48 = vld [vmem:[#allocation5 + $0x38] sm:$0xff] (!%p2580_p5)  ;;  %v2071_v61 = vld [vmem:[#allocation5 + $0x30] sm:$0xff] (!%p2580_p5) }
 0x839   : > { %2040 = vst [vmem:[#allocation5 + $0x58] sm:$0xff] %v2024_v57  ;;  %v2096_v57 = vld [vmem:[#allocation4 + $0x78] sm:$0xff] (!%p2580_p5)  ;;  %v2070_v3 = vld [vmem:[#allocation5 + $0x28] sm:$0xff] (!%p2580_p5) }
 0x83a   : > { %2038 = vst [vmem:[#allocation5 + $0x48] sm:$0xff] %v2022_v58  ;;  %2170 = vperm.xlu1 (!%p2580_p5), %3262, %v3276_v12   ;;  %v3280_v24 = vpop.eup (!%p2580_p5), %3279  ;;  %2949 = vmatprep.subr.bf16.mxu0 (!%p2580_p5), %v2238_v19  ;;  %v2239_v58 = vpack.c.bf16 (!%p2580_p5), %v2230_v21, %v2229_v34  ;;  %3291 = vrcp.f32 (!%p2580_p5), %v2096_v57 }
 0x83b   : > { %v3282_v54 = vpop.eup (!%p2580_p5), %3281  ;;  %2992 = vmatprep.subr.bf16.mxu1 (!%p2580_p5), %v2238_v19  ;;  %3293 = vrcp.f32 (!%p2580_p5), %v2095_v25  ;;  %2950 = vmatpush3.bf16.msra.mxu0 (!%p2580_p5), %v2238_v19 }
 0x83c   : > { %v2937_v5 = vpop.f32.mrb[44].mxu1  ;;  %2064 = sbr.rel (%p2580_p5) target bundleno = 2472 (0x9a8), region = 100  ;;  %2165 = vperm.xlu0 (!%p2580_p5), %3261, %v3278_v47   ;;  %v3284_v9 = vpop.eup (!%p2580_p5), %3283  ;;  %2951 = vmatprep.subr.bf16.mxu0 (!%p2580_p5), %v2239_v58 }
 0x83d   : > { %v2027_v41 = vadd.f32 %v2937_v5, %v1898_v2  ;;  %v1998_v4 = vpop.f32.mrb[45].mxu1  ;;  %v3286_v55 = vpop.eup (!%p2580_p5), %3285  ;;  %3000 = vmatpush3.bf16.msra.mxu1 (!%p2580_p5), %v2238_v19  ;;  %v2240_v2 = vpack.c.bf16 (!%p2580_p5), %v2232_v51, %v2231_v27 }
 0x83e   : > { %v2025_v45 = vadd.f32 %v1998_v4, %v1896_v38  ;;  %v2938_v31 = vpop.f32.mrb[46].mxu1  ;;  %2140 = vperm.xlu1 (!%p2580_p5), %3262, %v3280_v24   ;;  %2993 = vmatprep.subr.bf16.mxu1 (!%p2580_p5), %v2239_v58  ;;  %v2075_v44 = vld [vmem:[#allocation5 + $0x50] sm:$0xff] (!%p2580_p5) }
 0x83f   : > { %2043 = vst [vmem:[#allocation5 + $0x70] sm:$0xff] %v2027_v41  ;;  %v2028_v18 = vadd.f32 %v2938_v31, %v1899_v7  ;;  %v2001_v40 = vpop.f32.mrb[47].mxu1  ;;  %2952 = vmatpush3.bf16.msra.mxu0 (!%p2580_p5), %v2239_v58 }
 0x840   : > { %2041 = vst [vmem:[#allocation5 + $0x60] sm:$0xff] %v2025_v45  ;;  %v2026_v59 = vadd.f32 %v2001_v40, %v1897_v8  ;;  %2135 = vperm.xlu0 (!%p2580_p5), %3261, %v3282_v54   ;;  %v3288_v38 = vpop.eup (!%p2580_p5), %3287  ;;  %2953 = vmatprep.subr.bf16.mxu0 (!%p2580_p5), %v2240_v2  ;;  %v2073_v45 = vld [vmem:[#allocation5 + $0x40] sm:$0xff] (!%p2580_p5)  ;;  %v2066_v40 = vld [vmem:[#allocation5 + $0x8] sm:$0xff] (!%p2580_p5)  ;;  %v2076_v53 = vld [vmem:[#allocation5 + $0x58] sm:$0xff] (!%p2580_p5) }
 0x841   : > { %2044 = vst [vmem:[#allocation5 + $0x78] sm:$0xff] %v2028_v18  ;;  %3001 = vmatpush3.bf16.msra.mxu1 (!%p2580_p5), %v2239_v58  ;;  %v2074_v31 = vld [vmem:[#allocation5 + $0x48] sm:$0xff] (!%p2580_p5)  ;;  %v2065_v18 = vld [vmem:[#allocation5] sm:$0xff] (!%p2580_p5) }
 0x842   : > { %2042 = vst [vmem:[#allocation5 + $0x68] sm:$0xff] %v2026_v59  ;;  %2180 = vperm.xlu1 (!%p2580_p5), %3262, %v3284_v9   ;;  %v3290_v5 = vpop.eup (!%p2580_p5), %3289  ;;  %2994 = vmatprep.subr.bf16.mxu1 (!%p2580_p5), %v2240_v2 }
 0x843   : > { %2954 = vmatpush3.bf16.msra.mxu0 %v2240_v2 }
 0x844   : > { %2175 = vperm.xlu0 %3261, %v3286_v55   ;;  %v3292_v7 = vpop.eup %3291 }
 0x845   : > { %v3294_v41 = vpop.eup %3293  ;;  %3002 = vmatpush3.bf16.msra.mxu1 %v2240_v2 }
 0x846   : > { %2150 = vperm.xlu1 %3262, %v3288_v38   ;;  %v2079_v21 = vld [vmem:[#allocation5 + $0x70] sm:$0xff] }
 0x847   : > { %v2077_v36 = vld [vmem:[#allocation5 + $0x60] sm:$0xff] }
 0x848   : > { %2145 = vperm.xlu0 %3261, %v3290_v5   ;;  %v2080_v34 = vld [vmem:[#allocation5 + $0x78] sm:$0xff] }
 0x849   : > { %v2078_v39 = vld [vmem:[#allocation5 + $0x68] sm:$0xff] }
 0x84a   : > { %2190 = vperm.xlu1 %3262, %v3292_v7  }
 0x84c   : > { %2185 = vperm.xlu0 %3261, %v3294_v41  }
 0x8ad   : > { %v2156_v4 = vpop.permute.xlu1 %2155 }
 0x8ae   : > { %v2201_v22 = vmul.f32 %v2156_v4, %v2073_v45 }
 0x8af   : > { %v2116_v8 = vpop.permute.xlu0 %2115 }
 0x8b0   : > { %v2193_v43 = vmul.f32 %v2116_v8, %v2065_v18 }
 0x8b1   : > { %v2161_v59 = vpop.permute.xlu1 %2160 }
 0x8b2   : > { %v2202_v11 = vmul.f32 %v2161_v59, %v2074_v31 }
 0x8b3   : > { %v2121_v28 = vpop.permute.xlu0 %2120 }
 0x8b4   : > { %v2194_v10 = vmul.f32 %v2121_v28, %v2066_v40  ;;  %v2213_v17 = vpack.c.bf16 %v2202_v11, %v2201_v22 }
 0x8b5   : > { %v2131_v26 = vpop.permute.xlu1 %2130 }
 0x8b6   : > { %v2209_v1 = vpack.c.bf16 %v2194_v10, %v2193_v43  ;;  %v2196_v20 = vmul.f32 %v2131_v26, %v2068_v0  ;;  %2963 = vmatprep.mubr.bf16.mxu1 %v2213_v17 }
 0x8b7   : > { %v2126_v63 = vpop.permute.xlu0 %2125 }
 0x8b8   : > { %v2195_v30 = vmul.f32 %v2126_v63, %v2067_v56  ;;  %2955 = vmatprep.mubr.bf16.mxu0 %v2209_v1 }
 0x8b9   : > { %v2171_v32 = vpop.permute.xlu1 %2170 }
 0x8ba   : > { %v2210_v13 = vpack.c.bf16 %v2196_v20, %v2195_v30  ;;  %v2204_v46 = vmul.f32 %v2171_v32, %v2076_v53 }
 0x8bb   : > { %v2166_v33 = vpop.permute.xlu0 %2165 }
 0x8bc   : > { %v2203_v62 = vmul.f32 %v2166_v33, %v2075_v44  ;;  %2956 = vmatmul.mubr.bf16.vlgmr.msra.gmra.mrb[0].mxu0 %v2210_v13 }
 0x8bd   : > { %v2141_v23 = vpop.permute.xlu1 %2140 }
 0x8be   : > { %v2214_v29 = vpack.c.bf16 %v2204_v46, %v2203_v62  ;;  %v2198_v50 = vmul.f32 %v2141_v23, %v2070_v3 }
 0x8bf   : > { %v2136_v37 = vpop.permute.xlu0 %2135 }
 0x8c0   : > { %v2197_v42 = vmul.f32 %v2136_v37, %v2069_v52  ;;  %2964 = vmatmul.mubr.bf16.vlgmr.msra.gmra.mrb[0].mxu1 %v2214_v29 }
 0x8c1   : > { %v2181_v35 = vpop.permute.xlu1 %2180 }
 0x8c2   : > { %v2211_v60 = vpack.c.bf16 %v2198_v50, %v2197_v42  ;;  %v2206_v14 = vmul.f32 %v2181_v35, %v2078_v39 }
 0x8c3   : > { %v2176_v6 = vpop.permute.xlu0 %2175 }
 0x8c4   : > { %v2205_v49 = vmul.f32 %v2176_v6, %v2077_v36  ;;  %2959 = vmatprep.mubr.bf16.mxu0 %v2211_v60 }
 0x8c5   : > { %v2151_v12 = vpop.permute.xlu1 %2150 }
 0x8c6   : > { %v2215_v15 = vpack.c.bf16 %v2206_v14, %v2205_v49  ;;  %v2200_v16 = vmul.f32 %v2151_v12, %v2072_v48 }
 0x8c7   : > { %v2146_v47 = vpop.permute.xlu0 %2145 }
 0x8c8   : > { %v2199_v19 = vmul.f32 %v2146_v47, %v2071_v61  ;;  %2967 = vmatprep.mubr.bf16.mxu1 %v2215_v15 }
 0x8c9   : > { %v2191_v24 = vpop.permute.xlu1 %2190 }
 0x8ca   : > { %v2212_v57 = vpack.c.bf16 %v2200_v16, %v2199_v19  ;;  %v2208_v25 = vmul.f32 %v2191_v24, %v2080_v34 }
 0x8cb   : > { %v2186_v54 = vpop.permute.xlu0 %2185 }
 0x8cc   : > { %v2207_v58 = vmul.f32 %v2186_v54, %v2079_v21  ;;  %2960 = vmatmul.mubr.bf16.gmra.mrb[4].mxu0 %v2212_v57 }
 0x8ce   : > { %v2216_v27 = vpack.c.bf16 %v2208_v25, %v2207_v58 }
 0x8d0   : > { %2968 = vmatmul.mubr.bf16.gmra.mrb[4].mxu1 %v2216_v27 }
 0x98f   : > { %v2957_v51 = vpop.f32.mrb[0].mxu0 }
 0x990   : > { %2340 = vst [vmem:[%s4203_s15 + $0x10] sm:$0xff] %v2957_v51  ;;  %v2275_v9 = vpop.f32.mrb[1].mxu0 }
 0x991   : > { %2338 = vst [vmem:[%s4203_s15] sm:$0xff] %v2275_v9  ;;  %v2958_v55 = vpop.f32.mrb[2].mxu0 }
 0x992   : > { %2341 = vst [vmem:[%s4203_s15 + $0x18] sm:$0xff] %v2958_v55  ;;  %v2278_v2 = vpop.f32.mrb[3].mxu0 }
 0x993   : > { %2339 = vst [vmem:[%s4203_s15 + $0x8] sm:$0xff] %v2278_v2  ;;  %v2965_v38 = vpop.f32.mrb[0].mxu1 }
 0x994   : > { %2348 = vst [vmem:[%s4203_s15 + $0x50] sm:$0xff] %v2965_v38  ;;  %v2307_v5 = vpop.f32.mrb[1].mxu1 }
 0x995   : > { %2346 = vst [vmem:[%s4203_s15 + $0x40] sm:$0xff] %v2307_v5  ;;  %v2966_v7 = vpop.f32.mrb[2].mxu1 }
 0x996   : > { %2349 = vst [vmem:[%s4203_s15 + $0x58] sm:$0xff] %v2966_v7  ;;  %v2310_v41 = vpop.f32.mrb[3].mxu1 }
 0x997   : > { %2347 = vst [vmem:[%s4203_s15 + $0x48] sm:$0xff] %v2310_v41 }
 0x99f   : > { %v2961_v4 = vpop.f32.mrb[4].mxu0 }
 0x9a0   : > { %2344 = vst [vmem:[%s4203_s15 + $0x30] sm:$0xff] %v2961_v4  ;;  %v2291_v8 = vpop.f32.mrb[5].mxu0 }
 0x9a1   : > { %2342 = vst [vmem:[%s4203_s15 + $0x20] sm:$0xff] %v2291_v8  ;;  %v2962_v45 = vpop.f32.mrb[6].mxu0 }
 0x9a2   : > { %2345 = vst [vmem:[%s4203_s15 + $0x38] sm:$0xff] %v2962_v45  ;;  %v2294_v31 = vpop.f32.mrb[7].mxu0 }
 0x9a3   : > { %2343 = vst [vmem:[%s4203_s15 + $0x28] sm:$0xff] %v2294_v31  ;;  %v2969_v18 = vpop.f32.mrb[4].mxu1 }
 0x9a4   : > { %2352 = vst [vmem:[%s4203_s15 + $0x70] sm:$0xff] %v2969_v18  ;;  %v2323_v40 = vpop.f32.mrb[5].mxu1 }
 0x9a5   : > { %2350 = vst [vmem:[%s4203_s15 + $0x60] sm:$0xff] %v2323_v40  ;;  %v2970_v59 = vpop.f32.mrb[6].mxu1 }
 0x9a6   : > { %2353 = vst [vmem:[%s4203_s15 + $0x78] sm:$0xff] %v2970_v59  ;;  %v2326_v22 = vpop.f32.mrb[7].mxu1 }
 0x9a7   : > { %2351 = vst [vmem:[%s4203_s15 + $0x68] sm:$0xff] %v2326_v22 }
 0x9a8 PF: > { %s4802_s21 = sld [smem:[#allocation32_spill]]  ;;  %s4803_s2 = sld [smem:[#allocation33_spill]] }
 0x9a9   : > { %s2370_s13 = sshll.u32 %s4203_s15, 4  ;;  %s4804_s7 = sld [smem:[#allocation48_spill]]  ;;  %s4629_s13 = int_to_ptr.vmem [resolvable:$true] %s2370_s13 }
 0x9aa   : > { %s2355_s28 = scalar_lea.sflag [#allocation8], %s4169_s12  ;;  %s3523_s20 = scalar_lea.vmem %s4629_s13, 2048 }
 0x9ab   : > { %p3524_p8 = scmp.ne.s32.totalorder %s4629_s13, %s3523_s20  ;;  %p4805_p9 = scmp.ne.s32.totalorder %s4771_s10, 0 }
 0x9ac   : > { %s3697_s6 = smov [#allocation20]  }
 0x9ad   : > { %p3525_p2 = pnand %p3524_p8, %p4805_p9  ;;  %s3527_s15 = sshll.u32 %s3697_s6, 4  ;;  %s3528_s15 = int_to_ptr.vmem [resolvable:$false] %s3527_s15 }
 0x9ae   : > { %s2582_s11 = sshll.u32 %s4802_s21, 4  ;;  %s2583_s27 = sshll.u32 %s4803_s2, 5 }
 0x9af   : > { %s2367_s29 = sadd.s32 %s2583_s27, %s2582_s11  ;;  %p3526_p1 = pneg %p3525_p2 }
 0x9b0   : > { %s2584_s1 = sshll.u32 %s2367_s29, 7  ;;  %s3529_s14 = scalar_lea.vmem %s3528_s15, 4096 }
 0x9b1   : > { %s4634_s26 = scalar_lea.hbm %s4804_s7, %s2584_s1  ;;  %p3530_p3 = scmp.lt.s32.totalorder %s4629_s13, %s3528_s15 }
 0x9b2   : > { %p3531_p6 = scmp.lt.s32.totalorder %s3529_s14, %s3523_s20 }
 0x9b4   : > { %p3532_p0 = por %p3531_p6, %p3530_p3 }
 0x9b6   : > { %p3533_p10 = pnand %p3532_p0, %p3526_p1 }
 0x9b8   : > { %3536 = shalt.err (!%p3533_p10)
}
 0x9b9   : > { %s3537_s0 = scalar_lea.hbm %s4634_s26, 2048  ;;  %s3541_s2 = scalar_lea.hbm %s4804_s7, 8192 }
 0x9ba   : > { %p3538_p11 = scmp.ne.s32.totalorder %s4634_s26, %s3537_s0  ;;  %p3542_p12 = scmp.lt.u32.totalorder %s4634_s26, %s4804_s7 }
 0x9bb   : > { %p3543_p4 = scmp.lt.u32.totalorder %s3541_s2, %s3537_s0  ;;  %p3545_p8 = scmp.lt.u32.totalorder %s3537_s0, %s4634_s26 }
 0x9bc   : > { %p3539_p13 = pnand %p3538_p11, %p4805_p9 }
 0x9bd   : > { %p3544_p5 = por %p3543_p4, %p3542_p12 }
 0x9be   : > { %p3540_p7 = pneg %p3539_p13 }
 0x9bf   : > { %p3546_p2 = por %p3545_p8, %p3544_p5 }
 0x9c1   : > { %p3547_p1 = pnand %p3546_p2, %p3540_p7 }
 0x9c3   : > { %3550 = shalt.err (!%p3547_p1)
}
 0x9c4   : > { %s3698_s29 = smov 128   ;;  %s3699_s1 = smov 8  }
 0x9c5   : > { %3031 = dma.vmem_to_hbm [thread:$0]  (%p4805_p9), %s4629_s13, 2048, %s4634_s26, %s2355_s28, %s3698_s29, %s3698_s29, %s3699_s1  }
 0x9c6 PF: > { %p3076_p3 = scmp.ge.s32.totalorder %s3681_s25, 2  ;;  %s2385_s19 = sand.u32 1, %s3645_s16  }
 0x9c7   : > { %p4806_p6 = scmp.ne.s32.totalorder %s4772_s3, 0  ;;  %s2386_s8 = scalar_lea.sflag [#allocation8], %s2385_s19 }
 0x9c9   : > { %p3060_p0 = pnand %p3076_p3, %p4806_p6 }
 0x9cb   : > { %3628 = dma.done.wait (!%p3060_p0), %s2386_s8, 2048  }
 0x9cc   : > { %3630 = vsyncadd (!%p3060_p0), %s2386_s8, 4294965248  ;;  %s32_s25 = sadd.s32 1, %s3681_s25   ;;  %s4808_s13 = sld [smem:[#allocation29_spill]] }
 0x9cd   : > { %p4665_p10 = scmp.ge.s32.totalorder %s32_s25, 10   ;;  %s4809_s14 = sld [smem:[#allocation30_spill]] }
 0x9ce   : > { %s4810_s10 = sld [smem:[#allocation35_spill]]  ;;  %s4811_s3 = sld [smem:[#allocation36_spill]] }
 0x9cf   : > { %s4812_s12 = sld [smem:[#allocation37_spill]]  ;;  %s4814_s15 = smov %s4108_s4 }
 0x9d0   : > { %s4815_s16 = smov %s3649_s17  ;;  %s4816_s17 = smov %s3653_s18 }
 0x9d1   : > { %s4817_s18 = smov %s4049_s5  ;;  %s4818_s19 = smov %s3669_s22 }
 0x9d2   : > { %s4819_s20 = smov %s3673_s23  ;;  %s4820_s21 = smov %s3677_s24 }
 0x9d3   :  { %31 = sbr.rel (!%p4665_p10) target bundleno = 27 (0x1b), region = 150 }
 0x9d4   : > { %s4821_s22 = smov %s4810_s10  ;;  %s4822_s23 = smov %s4811_s3 }
 0x9d5   : > { %s4823_s24 = smov %s4812_s12 }
 0x9da   :  { %2391 = vsyncpa [#allocation7], 1 }
 0x9db   :  { %2393 = vsyncpa [#allocation7 + $0x1], 1 }
 0x9dc   :  { %2394 = vsyncpa [#allocation10], 1 }
 0x9dd   :  { %2396 = vsyncpa [#allocation10 + $0x1], 1 }
 0x9de   :  { %2397 = vsyncpa [#allocation13], 1 }
 0x9df   :  { %2398 = vsyncpa [#allocation16], 1 }
 0x9e0   :  { %2399 = vsyncpa [#allocation19], 1 }
 0x9e1   :  { %2400 = vsyncpa [#allocation8], 1 }
 0x9e2   :  { %2402 = vsyncpa [#allocation8 + $0x1], 1 }

</bundles_post_ra>
